<compile_context>
chip_gen: v7x
topology: tpu7x:2x2x1
jax: 0.10.0
libtpu: 0.0.40
codegen_flags: <defaults>
</compile_context>

<pallas_src>
import jax
import jax.numpy as jnp
from jax.experimental import pallas as pl
from jax.experimental.pallas import tpu as pltpu

# ---- stand-in for config.json / labels.json --------------------------------
CFG = dict(
    n_mfcc=16,          # config.preprocessing.featureExtractor.nMfcc
    stack_hidden=32,    # config.network.stack.nHidden   (nLayers=1, unidirectional)
    rep_hidden=32,      # config.network.representative.nHidden (nLayers=1, unidir.)
    n_genders=2, n_langs_first=3, n_langs_second=3, n_ages=4, n_fluencies=3,
    n_actions=6, n_objects=8, n_intents=10,
    sampler_active=True,   # config.network.sampler.isActive
)
BN_EPS = 1e-5
TIME_CHUNK_CAP = 8      # max timesteps per grid step (bounds the in-kernel unroll)
BATCH_BLOCK_CAP = 128   # max batch rows per grid step (MXU row fill)


# ---------------------------------------------------------------------------
# Fused kernel body (runs once per (batch-chunk, time-chunk) grid point).
# ---------------------------------------------------------------------------
def _network_kernel(x_ref, w_x_ref, b_stack_ref, w_h_ref,
                    w_rt_ref, w_rb_ref, b_rep_ref,
                    bn_scale_ref, bn_shift_ref, meta_ref,
                    wa_f_ref, wa_m_ref, ba_ref,
                    wo_f_ref, wo_m_ref, wo_a_ref, bo_ref,
                    wc_a_ref, wc_o_ref, bc_ref,
                    out_ref,
                    xp_ref, h_s_ref, c_s_ref, h_r_ref, c_r_ref, mx_ref):
    Tc, Bb, D = x_ref.shape
    Hs = h_s_ref.shape[-1]
    Hr2 = h_r_ref.shape[-1]            # 2*Hr (fused [Action | Object] state)
    Hr = Hr2 // 2
    nA = ba_ref.shape[-1]

    t_idx = pl.program_id(1)
    nt = pl.num_programs(1)

    # ---- init recurrent state / running max at the first time chunk --------
    @pl.when(t_idx == 0)
    def _():
        h_s_ref[...] = jnp.zeros_like(h_s_ref)
        c_s_ref[...] = jnp.zeros_like(c_s_ref)
        h_r_ref[...] = jnp.zeros_like(h_r_ref)
        c_r_ref[...] = jnp.zeros_like(c_r_ref)
        # NOTE: -inf init is correct for T >= 1 (first step overwrites it);
        # a T == 0 sequence would emit -inf, matching max-over-empty semantics.
        mx_ref[...] = jnp.full_like(mx_ref, -jnp.inf)

    # ---- hoist loop-invariant loads / broadcasts (JAX does not CSE them) ----
    w_h = w_h_ref[...]                                      # (Hs, 4Hs)
    w_rt = w_rt_ref[...]                                    # (Hs, 8Hr)
    w_rb = w_rb_ref[...]                                    # (2Hr, 8Hr)
    b_rep_b = jnp.broadcast_to(b_rep_ref[...], (Bb, 4 * Hr2))
    bn_scale_b = jnp.broadcast_to(bn_scale_ref[...], (Bb, Hr2))

    # Per-lane (mul, add) fix-up turning sigmoid into tanh on the g-gate block:
    # tanh(x) = 2*sigmoid(2x) - 1, with the *2 pre-folded into the g-gate
    # weight/bias columns in pack_params.  One full-width sigmoid per LSTM,
    # one fused mul-add here.
    one, two, mone, zero = (jnp.float32(1.0), jnp.float32(2.0),
                            jnp.float32(-1.0), jnp.float32(0.0))
    lane_s = jax.lax.broadcasted_iota(jnp.int32, (Bb, 4 * Hs), 1)
    is_g_s = (lane_s >= 2 * Hs) & (lane_s < 3 * Hs)
    gmul_s = jnp.where(is_g_s, two, one)
    gadd_s = jnp.where(is_g_s, mone, zero)
    lane_r = jax.lax.broadcasted_iota(jnp.int32, (Bb, 4 * Hr2), 1)
    is_g_r = (lane_r >= 2 * Hr2) & (lane_r < 3 * Hr2)
    gmul_r = jnp.where(is_g_r, two, one)
    gadd_r = jnp.where(is_g_r, mone, zero)

    # ---- stack-LSTM input projection hoisted out of the recurrence:
    #      one (Tc*Bb, D) @ (D, 4Hs) matmul per chunk, bias pre-added.
    x_chunk = x_ref[...].reshape(Tc * Bb, D)
    xp_ref[...] = (jnp.dot(x_chunk, w_x_ref[...],
                           preferred_element_type=jnp.float32)
                   + b_stack_ref[...])

    def step(tt, carry):
        h_s, c_s, h_r, c_r, mx = carry

        # -- stack LSTM: only the h @ Whh recurrence is on the serial path ----
        row0 = pl.multiple_of(tt * Bb, 8)
        gx = xp_ref[pl.ds(row0, Bb), :]                              # (Bb, 4Hs)
        g = gx + jnp.dot(h_s, w_h, preferred_element_type=jnp.float32)
        a = jax.nn.sigmoid(g)                                        # 1 EUP call
        gates = a * gmul_s + gadd_s                                  # tanh fix-up
        i_g = gates[:, 0 * Hs:1 * Hs]
        f_g = gates[:, 1 * Hs:2 * Hs]
        g_g = gates[:, 2 * Hs:3 * Hs]
        o_g = gates[:, 3 * Hs:4 * Hs]
        c_s = f_g * c_s + i_g * g_g
        h_s = o_g * jnp.tanh(c_s)

        # -- repAction + repObject fused; concat replaced by summed dots ------
        gr = (jnp.dot(h_s, w_rt, preferred_element_type=jnp.float32)
              + jnp.dot(h_r, w_rb, preferred_element_type=jnp.float32)
              + b_rep_b)                                             # (Bb, 8Hr)
        ar = jax.nn.sigmoid(gr)                                      # 1 EUP call
        gr_f = ar * gmul_r + gadd_r
        i_r = gr_f[:, 0 * Hr2:1 * Hr2]
        f_r = gr_f[:, 1 * Hr2:2 * Hr2]
        g_r = gr_f[:, 2 * Hr2:3 * Hr2]
        o_r = gr_f[:, 3 * Hr2:4 * Hr2]
        c_r = f_r * c_r + i_r * g_r
        h_r = o_r * jnp.tanh(c_r)

        # -- online max of the BN-scaled state (shift added once in epilogue) -
        mx = jnp.maximum(mx, h_r * bn_scale_b)
        return h_s, c_s, h_r, c_r, mx

    init = (h_s_ref[...], c_s_ref[...], h_r_ref[...], c_r_ref[...], mx_ref[...])
    h_s, c_s, h_r, c_r, mx = jax.lax.fori_loop(0, Tc, step, init, unroll=True)
    h_s_ref[...] = h_s
    c_s_ref[...] = c_s
    h_r_ref[...] = h_r
    c_r_ref[...] = c_r
    mx_ref[...] = mx

    # ---------------- head: runs once, on the last time chunk ----------------
    @pl.when(t_idx == nt - 1)
    def _():
        bn = mx + bn_shift_ref[...]          # BN shift folded in once
        max_a = bn[:, :Hr]
        max_o = bn[:, Hr:]
        meta = meta_ref[...]

        # transformerAction: concat removed -> summed small dots
        logits_a = (jnp.dot(max_a, wa_f_ref[...], preferred_element_type=jnp.float32)
                    + jnp.dot(meta, wa_m_ref[...], preferred_element_type=jnp.float32)
                    + ba_ref[...])

        if CFG['sampler_active']:
            # torch.scatter(zeros, 1, softmax(x).argmax, 1) == one-hot(argmax(x))
            # (softmax monotonic); exact-equality + min-lane index tie-break
            # matches torch argmax ("first max") semantics — do not add tolerance.
            lane = jax.lax.broadcasted_iota(jnp.int32, logits_a.shape, 1)
            amax = jnp.max(logits_a, axis=1, keepdims=True)
            idx = jnp.min(jnp.where(logits_a == amax, lane, nA), axis=1,
                          keepdims=True)
            y_decided = (lane == idx).astype(jnp.float32)
            # TODO(synk): training-time scheduled sampling (torch.rand decider
            # with yAction/epoch) is stochastic; only the yAction=None branch here.
            logits_o = (jnp.dot(max_o, wo_f_ref[...], preferred_element_type=jnp.float32)
                        + jnp.dot(meta, wo_m_ref[...], preferred_element_type=jnp.float32)
                        + jnp.dot(y_decided, wo_a_ref[...], preferred_element_type=jnp.float32)
                        + bo_ref[...])
        else:
            logits_o = (jnp.dot(max_o, wo_f_ref[...], preferred_element_type=jnp.float32)
                        + jnp.dot(meta, wo_m_ref[...], preferred_element_type=jnp.float32)
                        + bo_ref[...])

        intent = (jnp.dot(logits_a, wc_a_ref[...], preferred_element_type=jnp.float32)
                  + jnp.dot(logits_o, wc_o_ref[...], preferred_element_type=jnp.float32)
                  + bc_ref[...])

        # One lane-dense (Bb, 128) output slab: [logits_a | logits_o | intent | 0]
        nO = logits_o.shape[-1]
        nI = intent.shape[-1]
        pieces = [logits_a, logits_o, intent]
        pad_w = out_ref.shape[-1] - nA - nO - nI
        if pad_w > 0:
            pieces.append(jnp.zeros((Bb, pad_w), jnp.float32))
        out_ref[...] = jnp.concatenate(pieces, axis=1)


# ---------------------------------------------------------------------------
# Parameter init (deterministic, PyTorch-style layouts / uniform ranges)
# ---------------------------------------------------------------------------
def _uniform(key, shape, k):
    return jax.random.uniform(key, shape, jnp.float32, -k, k)


def init_params(key):
    keys = iter(jax.random.split(key, 64))
    p = {}

    def lstm_params(d_in, h):
        k = 1.0 / jnp.sqrt(h)
        return (_uniform(next(keys), (4 * h, d_in), k),   # w_ih (gate order i,f,g,o)
                _uniform(next(keys), (4 * h, h), k),       # w_hh
                _uniform(next(keys), (4 * h,), k),         # b_ih
                _uniform(next(keys), (4 * h,), k))         # b_hh

    def bn_params(f):
        gamma = 0.5 + jax.random.uniform(next(keys), (f,), jnp.float32)   # (0.5, 1.5)
        beta = 0.1 * jax.random.normal(next(keys), (f,), jnp.float32)
        mean = 0.1 * jax.random.normal(next(keys), (f,), jnp.float32)
        var = 1.0 + 0.1 * jax.random.uniform(next(keys), (f,), jnp.float32)
        return gamma, beta, mean, var

    def linear_params(f_in, f_out):
        k = 1.0 / jnp.sqrt(f_in)
        return (_uniform(next(keys), (f_out, f_in), k),    # PyTorch (out, in)
                _uniform(next(keys), (f_out,), k))

    meta_sz = (CFG['n_genders'] + CFG['n_langs_first'] + CFG['n_langs_second']
               + CFG['n_ages'] + CFG['n_fluencies'])
    trans_in = CFG['rep_hidden'] + meta_sz

    p['stack'] = lstm_params(CFG['n_mfcc'], CFG['stack_hidden'])
    p['repA'] = lstm_params(CFG['stack_hidden'], CFG['rep_hidden'])
    p['repO'] = lstm_params(CFG['stack_hidden'], CFG['rep_hidden'])
    p['bnA'] = bn_params(CFG['rep_hidden'])
    p['bnO'] = bn_params(CFG['rep_hidden'])
    p['transA'] = linear_params(trans_in, CFG['n_actions'])
    obj_in = trans_in + (CFG['n_actions'] if CFG['sampler_active'] else 0)
    p['transO'] = linear_params(obj_in, CFG['n_objects'])
    p['comb'] = linear_params(CFG['n_actions'] + CFG['n_objects'], CFG['n_intents'])
    return p


# ---------------------------------------------------------------------------
# One-time packing of PyTorch-layout params into kernel-ready fused weights.
# ---------------------------------------------------------------------------
def pack_params(p):
    Hs, Hr = CFG['stack_hidden'], CFG['rep_hidden']
    meta_sz = (CFG['n_genders'] + CFG['n_langs_first'] + CFG['n_langs_second']
               + CFG['n_ages'] + CFG['n_fluencies'])

    # -- stack LSTM: split input / recurrent weights; pre-scale g-gate by 2 ----
    wih_s, whh_s, bih_s, bhh_s = p['stack']
    scale_s = jnp.ones((4 * Hs,), jnp.float32).at[2 * Hs:3 * Hs].set(2.0)
    w_x = wih_s.T * scale_s                                  # (D, 4Hs)
    w_h = whh_s.T * scale_s                                  # (Hs, 4Hs)
    b_stack = ((bih_s + bhh_s) * scale_s).reshape(1, 4 * Hs)

    # -- repAction + repObject fused: columns [iA iO | fA fO | gA gO | oA oO] --
    wih_a, whh_a, bih_a, bhh_a = p['repA']
    wih_o, whh_o, bih_o, bhh_o = p['repO']
    b_a, b_o = bih_a + bhh_a, bih_o + bhh_o
    zero = jnp.zeros((Hr, Hr), jnp.float32)
    top_cols, bot_cols, bias_cols = [], [], []
    for k in range(4):                                       # gates i, f, g, o
        sl = slice(k * Hr, (k + 1) * Hr)
        top_cols += [wih_a[sl].T, wih_o[sl].T]               # rows: h_stack
        bot_cols += [jnp.concatenate([whh_a[sl].T, zero], axis=0),   # rows: [hA|hO]
                     jnp.concatenate([zero, whh_o[sl].T], axis=0)]
        bias_cols += [b_a[sl], b_o[sl]]
    scale_r = jnp.ones((8 * Hr,), jnp.float32).at[4 * Hr:6 * Hr].set(2.0)
    w_rt = jnp.concatenate(top_cols, axis=1) * scale_r       # (Hs, 8Hr)
    w_rb = jnp.concatenate(bot_cols, axis=1) * scale_r       # (2Hr, 8Hr)
    b_rep = (jnp.concatenate(bias_cols) * scale_r).reshape(1, 8 * Hr)

    # -- eval-mode BatchNorm folded to per-feature scale / shift ---------------
    def bn_affine(bn):
        gamma, beta, mean, var = bn
        scale = gamma * jax.lax.rsqrt(var + BN_EPS)
        return scale, beta - mean * scale

    sa, ta = bn_affine(p['bnA'])
    so, to = bn_affine(p['bnO'])
    bn_scale = jnp.concatenate([sa, so]).reshape(1, 2 * Hr)
    bn_shift = jnp.concatenate([ta, to]).reshape(1, 2 * Hr)

    # -- head weights split per input block (removes epilogue concats) --------
    wa, ba = p['transA']
    wo, bo = p['transO']
    wc, bc = p['comb']
    nA = CFG['n_actions']
    packed = dict(
        w_x=w_x, b_stack=b_stack, w_h=w_h,
        w_rt=w_rt, w_rb=w_rb, b_rep=b_rep,
        bn_scale=bn_scale, bn_shift=bn_shift,
        wa_f=wa[:, :Hr].T, wa_m=wa[:, Hr:].T, ba=ba.reshape(1, -1),
        wo_f=wo[:, :Hr].T, wo_m=wo[:, Hr:Hr + meta_sz].T, bo=bo.reshape(1, -1),
        wc_a=wc[:, :nA].T, wc_o=wc[:, nA:].T, bc=bc.reshape(1, -1),
    )
    if CFG['sampler_active']:
        packed['wo_a'] = wo[:, Hr + meta_sz:].T
    else:
        packed['wo_a'] = jnp.zeros((nA, CFG['n_objects']), jnp.float32)  # unused
    return packed


# ---------------------------------------------------------------------------
# Forward pass wrapper (inference: dropout = identity, eval BN, yAction=None)
# ---------------------------------------------------------------------------
def forward(packed, X, yGender, yLangFirst, yLangSecond, yAge, yFluency):
    B, T, D = X.shape
    nA, nO, nI = CFG['n_actions'], CFG['n_objects'], CFG['n_intents']
    Hs, Hr = CFG['stack_hidden'], CFG['rep_hidden']

    meta = jnp.concatenate([yGender, yLangFirst, yLangSecond, yAge, yFluency], axis=1)
    meta_sz = meta.shape[1]

    # Batch padding to a sublane multiple (free) + per-core batch block.
    B8 = -(-B // 8) * 8
    Bb = min(B8, BATCH_BLOCK_CAP)
    B_pad = -(-B8 // Bb) * Bb
    nb = B_pad // Bb
    # Time chunking: largest divisor of T <= cap (bounds the in-kernel unroll
    # and the X VMEM block; chunks are pipelined by the grid).
    Tc = next(tc for tc in range(min(T, TIME_CHUNK_CAP), 0, -1) if T % tc == 0)
    nt = T // Tc

    x_tbd = jnp.transpose(X, (1, 0, 2))            # time-major once, at the boundary
    if B_pad != B:
        x_tbd = jnp.pad(x_tbd, ((0, 0), (0, B_pad - B), (0, 0)))
        meta = jnp.pad(meta, ((0, B_pad - B), (0, 0)))

    out_w = -(-(nA + nO + nI) // 128) * 128        # lane-dense output slab width

    def full2d(arr):
        return pl.BlockSpec(arr.shape, lambda b, t: (0, 0))

    in_specs = [
        pl.BlockSpec((Tc, Bb, D), lambda b, t: (t, b, 0)),       # X
        full2d(packed['w_x']), full2d(packed['b_stack']), full2d(packed['w_h']),
        full2d(packed['w_rt']), full2d(packed['w_rb']), full2d(packed['b_rep']),
        full2d(packed['bn_scale']), full2d(packed['bn_shift']),
        pl.BlockSpec((Bb, meta_sz), lambda b, t: (b, 0)),        # meta
        full2d(packed['wa_f']), full2d(packed['wa_m']), full2d(packed['ba']),
        full2d(packed['wo_f']), full2d(packed['wo_m']), full2d(packed['wo_a']),
        full2d(packed['bo']),
        full2d(packed['wc_a']), full2d(packed['wc_o']), full2d(packed['bc']),
    ]
    out_spec = pl.BlockSpec((Bb, out_w), lambda b, t: (b, 0))

    grid_spec = pltpu.PrefetchScalarGridSpec(
        num_scalar_prefetch=0,
        grid=(nb, nt),
        in_specs=in_specs,
        out_specs=out_spec,
        scratch_shapes=[
            pltpu.VMEM((Tc * Bb, 4 * Hs), jnp.float32),   # hoisted x-projection
            pltpu.VMEM((Bb, Hs), jnp.float32),            # h (stack)
            pltpu.VMEM((Bb, Hs), jnp.float32),            # c (stack)
            pltpu.VMEM((Bb, 2 * Hr), jnp.float32),        # h (repA | repO)
            pltpu.VMEM((Bb, 2 * Hr), jnp.float32),        # c (repA | repO)
            pltpu.VMEM((Bb, 2 * Hr), jnp.float32),        # running BN-scaled max
        ],
    )

    slab = pl.pallas_call(
        _network_kernel,
        out_shape=jax.ShapeDtypeStruct((B_pad, out_w), jnp.float32),
        grid_spec=grid_spec,
        compiler_params=pltpu.CompilerParams(
            dimension_semantics=("parallel", "arbitrary"),
            vmem_limit_bytes=32 * 1024 * 1024),
    )(x_tbd, packed['w_x'], packed['b_stack'], packed['w_h'],
      packed['w_rt'], packed['w_rb'], packed['b_rep'],
      packed['bn_scale'], packed['bn_shift'], meta,
      packed['wa_f'], packed['wa_m'], packed['ba'],
      packed['wo_f'], packed['wo_m'], packed['wo_a'], packed['bo'],
      packed['wc_a'], packed['wc_o'], packed['bc'])

    return (slab[:B, :nA], slab[:B, nA:nA + nO],
            slab[:B, nA + nO:nA + nO + nI])


# ---------------------------------------------------------------------------
# Pure-JAX reference (mirrors the PyTorch module) for a correctness check.
# ---------------------------------------------------------------------------
def _lstm_ref(x_btd, w_ih, w_hh, b_ih, b_hh):
    B, T, _ = x_btd.shape
    H = w_hh.shape[1]

    def step(carry, x_t):
        h, c = carry
        g = x_t @ w_ih.T + h @ w_hh.T + b_ih + b_hh
        i = jax.nn.sigmoid(g[:, :H]); f = jax.nn.sigmoid(g[:, H:2 * H])
        gg = jnp.tanh(g[:, 2 * H:3 * H]); o = jax.nn.sigmoid(g[:, 3 * H:])
        c = f * c + i * gg
        h = o * jnp.tanh(c)
        return (h, c), h

    z = jnp.zeros((B, H), jnp.float32)
    _, hs = jax.lax.scan(step, (z, z), jnp.transpose(x_btd, (1, 0, 2)))
    return jnp.transpose(hs, (1, 0, 2))


def forward_ref(params, X, yGender, yLangFirst, yLangSecond, yAge, yFluency):
    out = _lstm_ref(X, *params['stack'])
    oA = _lstm_ref(out, *params['repA'])
    oO = _lstm_ref(out, *params['repO'])
    gA, bA_, mA, vA = params['bnA']
    gO, bO_, mO, vO = params['bnO']
    oA = (oA - mA) * jax.lax.rsqrt(vA + BN_EPS) * gA + bA_
    oO = (oO - mO) * jax.lax.rsqrt(vO + BN_EPS) * gO + bO_
    oA, oO = oA.max(axis=1), oO.max(axis=1)
    meta = jnp.concatenate([yGender, yLangFirst, yLangSecond, yAge, yFluency], axis=1)
    wA, bA = params['transA']
    actA = jnp.concatenate([oA, meta], axis=1) @ wA.T + bA
    if CFG['sampler_active']:
        onehot = jax.nn.one_hot(jnp.argmax(jax.nn.softmax(actA, -1), axis=1),
                                CFG['n_actions'], dtype=jnp.float32)
        featO = jnp.concatenate([oO, meta, onehot], axis=1)
    else:
        featO = jnp.concatenate([oO, meta], axis=1)
    wO, bO = params['transO']
    actO = featO @ wO.T + bO
    wC, bC = params['comb']
    return actA, actO, jnp.concatenate([actA, actO], axis=1) @ wC.T + bC


# ---------------------------------------------------------------------------
if __name__ == "__main__":
    key = jax.random.PRNGKey(0)
    k_param, k_x = jax.random.split(key)
    params = init_params(k_param)
    packed = pack_params(params)

    B, T = 2, 16           # T=16 -> two time chunks, exercising the pipelined path
    X = jax.random.normal(k_x, (B, T, CFG['n_mfcc']), jnp.float32)
    yGender = jax.nn.one_hot(jnp.array([0, 1]), CFG['n_genders'], dtype=jnp.float32)
    yLangFirst = jax.nn.one_hot(jnp.array([1, 2]), CFG['n_langs_first'], dtype=jnp.float32)
    yLangSecond = jax.nn.one_hot(jnp.array([0, 1]), CFG['n_langs_second'], dtype=jnp.float32)
    yAge = jax.nn.one_hot(jnp.array([2, 3]), CFG['n_ages'], dtype=jnp.float32)
    yFluency = jax.nn.one_hot(jnp.array([1, 0]), CFG['n_fluencies'], dtype=jnp.float32)

    fwd = jax.jit(forward)
    outAction, outObject, outIntent = fwd(packed, X, yGender, yLangFirst,
                                          yLangSecond, yAge, yFluency)
    jax.block_until_ready((outAction, outObject, outIntent))

    assert outAction.shape == (B, CFG['n_actions'])
    assert outObject.shape == (B, CFG['n_objects'])
    assert outIntent.shape == (B, CFG['n_intents'])
    assert jnp.all(jnp.isfinite(outIntent))

    refA, refO, refI = forward_ref(params, X, yGender, yLangFirst,
                                   yLangSecond, yAge, yFluency)
    assert jnp.allclose(outAction, refA, rtol=2e-2, atol=5e-3)
    assert jnp.allclose(outObject, refO, rtol=2e-2, atol=5e-3)
    assert jnp.allclose(outIntent, refI, rtol=2e-2, atol=5e-3)

    print("KERNEL_OK")
</pallas_src>

<mosaic_0001>
module attributes {stable_mosaic.version = 11 : i64} {
  func.func @_network_kernel(%arg0: i32, %arg1: i32, %arg2: memref<8x8x16xf32, #tpu.memory_space<vmem>>, %arg3: memref<16x128xf32, #tpu.memory_space<vmem>>, %arg4: memref<1x128xf32, #tpu.memory_space<vmem>>, %arg5: memref<32x128xf32, #tpu.memory_space<vmem>>, %arg6: memref<32x256xf32, #tpu.memory_space<vmem>>, %arg7: memref<64x256xf32, #tpu.memory_space<vmem>>, %arg8: memref<1x256xf32, #tpu.memory_space<vmem>>, %arg9: memref<1x64xf32, #tpu.memory_space<vmem>>, %arg10: memref<1x64xf32, #tpu.memory_space<vmem>>, %arg11: memref<8x15xf32, #tpu.memory_space<vmem>>, %arg12: memref<32x6xf32, #tpu.memory_space<vmem>>, %arg13: memref<15x6xf32, #tpu.memory_space<vmem>>, %arg14: memref<1x6xf32, #tpu.memory_space<vmem>>, %arg15: memref<32x8xf32, #tpu.memory_space<vmem>>, %arg16: memref<15x8xf32, #tpu.memory_space<vmem>>, %arg17: memref<6x8xf32, #tpu.memory_space<vmem>>, %arg18: memref<1x8xf32, #tpu.memory_space<vmem>>, %arg19: memref<6x10xf32, #tpu.memory_space<vmem>>, %arg20: memref<8x10xf32, #tpu.memory_space<vmem>>, %arg21: memref<1x10xf32, #tpu.memory_space<vmem>>, %arg22: memref<8x128xf32, #tpu.memory_space<vmem>>, %arg23: memref<64x128xf32, #tpu.memory_space<vmem>>, %arg24: memref<8x32xf32, #tpu.memory_space<vmem>>, %arg25: memref<8x32xf32, #tpu.memory_space<vmem>>, %arg26: memref<8x64xf32, #tpu.memory_space<vmem>>, %arg27: memref<8x64xf32, #tpu.memory_space<vmem>>, %arg28: memref<8x64xf32, #tpu.memory_space<vmem>>) attributes {dimension_semantics = [#tpu.dimension_semantics<parallel>, #tpu.dimension_semantics<arbitrary>], iteration_bounds = array<i64: 1, 2>, scalar_prefetch = 0 : i64, scratch_operands = 6 : i64, tpu.core_type = #tpu.core_type<tc>, window_params = [{transform_indices = @transform_0, window_bounds = array<i64: 8, 8, 16>}, {pipeline_mode = #tpu.pipeline_mode<synchronous>, transform_indices = @transform_1, window_bounds = array<i64: 16, 128>}, {pipeline_mode = #tpu.pipeline_mode<synchronous>, transform_indices = @transform_2, window_bounds = array<i64: 1, 128>}, {pipeline_mode = #tpu.pipeline_mode<synchronous>, transform_indices = @transform_3, window_bounds = array<i64: 32, 128>}, {pipeline_mode = #tpu.pipeline_mode<synchronous>, transform_indices = @transform_4, window_bounds = array<i64: 32, 256>}, {pipeline_mode = #tpu.pipeline_mode<synchronous>, transform_indices = @transform_5, window_bounds = array<i64: 64, 256>}, {pipeline_mode = #tpu.pipeline_mode<synchronous>, transform_indices = @transform_6, window_bounds = array<i64: 1, 256>}, {pipeline_mode = #tpu.pipeline_mode<synchronous>, transform_indices = @transform_7, window_bounds = array<i64: 1, 64>}, {pipeline_mode = #tpu.pipeline_mode<synchronous>, transform_indices = @transform_8, window_bounds = array<i64: 1, 64>}, {transform_indices = @transform_9, window_bounds = array<i64: 8, 15>}, {pipeline_mode = #tpu.pipeline_mode<synchronous>, transform_indices = @transform_10, window_bounds = array<i64: 32, 6>}, {pipeline_mode = #tpu.pipeline_mode<synchronous>, transform_indices = @transform_11, window_bounds = array<i64: 15, 6>}, {pipeline_mode = #tpu.pipeline_mode<synchronous>, transform_indices = @transform_12, window_bounds = array<i64: 1, 6>}, {pipeline_mode = #tpu.pipeline_mode<synchronous>, transform_indices = @transform_13, window_bounds = array<i64: 32, 8>}, {pipeline_mode = #tpu.pipeline_mode<synchronous>, transform_indices = @transform_14, window_bounds = array<i64: 15, 8>}, {pipeline_mode = #tpu.pipeline_mode<synchronous>, transform_indices = @transform_15, window_bounds = array<i64: 6, 8>}, {pipeline_mode = #tpu.pipeline_mode<synchronous>, transform_indices = @transform_16, window_bounds = array<i64: 1, 8>}, {pipeline_mode = #tpu.pipeline_mode<synchronous>, transform_indices = @transform_17, window_bounds = array<i64: 6, 10>}, {pipeline_mode = #tpu.pipeline_mode<synchronous>, transform_indices = @transform_18, window_bounds = array<i64: 8, 10>}, {pipeline_mode = #tpu.pipeline_mode<synchronous>, transform_indices = @transform_19, window_bounds = array<i64: 1, 10>}, {transform_indices = @transform_20, window_bounds = array<i64: 8, 128>}]} {
    %c0_i32 = arith.constant 0 : i32
    %0 = arith.cmpi eq, %arg1, %c0_i32 : i32
    %1 = arith.extui %0 : i1 to i32
    %c0_i32_0 = arith.constant 0 : i32
    %2 = arith.cmpi ne, %1, %c0_i32_0 : i32
    scf.if %2 {
      %cst_106 = arith.constant 0.000000e+00 : f32
      %409 = vector.broadcast %cst_106 : f32 to vector<8x32xf32>
      %c0_107 = arith.constant 0 : index
      %c0_108 = arith.constant 0 : index
      %410 = vector.load %arg24[%c0_107, %c0_108] : memref<8x32xf32, #tpu.memory_space<vmem>>, vector<8x32xf32>
      tpu.vector_store %arg24[%c0_107, %c0_108], %409 {strides = array<i32>} : memref<8x32xf32, #tpu.memory_space<vmem>>, vector<8x32xf32>,
      %cst_109 = arith.constant 0.000000e+00 : f32
      %411 = vector.broadcast %cst_109 : f32 to vector<8x32xf32>
      %c0_110 = arith.constant 0 : index
      %c0_111 = arith.constant 0 : index
      %412 = vector.load %arg25[%c0_110, %c0_111] : memref<8x32xf32, #tpu.memory_space<vmem>>, vector<8x32xf32>
      tpu.vector_store %arg25[%c0_110, %c0_111], %411 {strides = array<i32>} : memref<8x32xf32, #tpu.memory_space<vmem>>, vector<8x32xf32>,
      %cst_112 = arith.constant 0.000000e+00 : f32
      %413 = vector.broadcast %cst_112 : f32 to vector<8x64xf32>
      %c0_113 = arith.constant 0 : index
      %c0_114 = arith.constant 0 : index
      %414 = vector.load %arg26[%c0_113, %c0_114] : memref<8x64xf32, #tpu.memory_space<vmem>>, vector<8x64xf32>
      tpu.vector_store %arg26[%c0_113, %c0_114], %413 {strides = array<i32>} : memref<8x64xf32, #tpu.memory_space<vmem>>, vector<8x64xf32>,
      %cst_115 = arith.constant 0.000000e+00 : f32
      %415 = vector.broadcast %cst_115 : f32 to vector<8x64xf32>
      %c0_116 = arith.constant 0 : index
      %c0_117 = arith.constant 0 : index
      %416 = vector.load %arg27[%c0_116, %c0_117] : memref<8x64xf32, #tpu.memory_space<vmem>>, vector<8x64xf32>
      tpu.vector_store %arg27[%c0_116, %c0_117], %415 {strides = array<i32>} : memref<8x64xf32, #tpu.memory_space<vmem>>, vector<8x64xf32>,
      %cst_118 = arith.constant 0xFF800000 : f32
      %417 = vector.broadcast %cst_118 : f32 to vector<8x64xf32>
      %c0_119 = arith.constant 0 : index
      %c0_120 = arith.constant 0 : index
      %418 = vector.load %arg28[%c0_119, %c0_120] : memref<8x64xf32, #tpu.memory_space<vmem>>, vector<8x64xf32>
      tpu.vector_store %arg28[%c0_119, %c0_120], %417 {strides = array<i32>} : memref<8x64xf32, #tpu.memory_space<vmem>>, vector<8x64xf32>,
    } else {
    }
    %c0 = arith.constant 0 : index
    %c0_1 = arith.constant 0 : index
    %3 = vector.load %arg5[%c0, %c0_1] : memref<32x128xf32, #tpu.memory_space<vmem>>, vector<32x128xf32>
    %c0_2 = arith.constant 0 : index
    %c0_3 = arith.constant 0 : index
    %4 = vector.load %arg6[%c0_2, %c0_3] : memref<32x256xf32, #tpu.memory_space<vmem>>, vector<32x256xf32>
    %c0_4 = arith.constant 0 : index
    %c0_5 = arith.constant 0 : index
    %5 = vector.load %arg7[%c0_4, %c0_5] : memref<64x256xf32, #tpu.memory_space<vmem>>, vector<64x256xf32>
    %c0_6 = arith.constant 0 : index
    %c0_7 = arith.constant 0 : index
    %6 = vector.load %arg8[%c0_6, %c0_7] : memref<1x256xf32, #tpu.memory_space<vmem>>, vector<1x256xf32>
    %7 = vector.shape_cast %6 : vector<1x256xf32> to vector<1x256xf32>
    %8 = vector.broadcast %7 : vector<1x256xf32> to vector<8x256xf32>
    %c0_8 = arith.constant 0 : index
    %c0_9 = arith.constant 0 : index
    %9 = vector.load %arg9[%c0_8, %c0_9] : memref<1x64xf32, #tpu.memory_space<vmem>>, vector<1x64xf32>
    %10 = vector.shape_cast %9 : vector<1x64xf32> to vector<1x64xf32>
    %11 = vector.broadcast %10 : vector<1x64xf32> to vector<8x64xf32>
    %12 = tpu.iota {dimensions = array<i32: 1>} : vector<8x128xi32>
    %c64_i32 = arith.constant 64 : i32
    %13 = vector.broadcast %c64_i32 : i32 to vector<8x128xi32>
    %14 = arith.cmpi sge, %12, %13 : vector<8x128xi32>
    %c96_i32 = arith.constant 96 : i32
    %15 = vector.broadcast %c96_i32 : i32 to vector<8x128xi32>
    %16 = arith.cmpi slt, %12, %15 : vector<8x128xi32>
    %17 = arith.andi %14, %16 : vector<8x128xi1>
    %cst = arith.constant 2.000000e+00 : f32
    %cst_10 = arith.constant 1.000000e+00 : f32
    %18 = vector.broadcast %cst : f32 to vector<8x128xf32>
    %19 = vector.broadcast %cst_10 : f32 to vector<8x128xf32>
    %20 = arith.select %17, %18, %19 : vector<8x128xi1>, vector<8x128xf32>
    %cst_11 = arith.constant -1.000000e+00 : f32
    %cst_12 = arith.constant 0.000000e+00 : f32
    %21 = vector.broadcast %cst_11 : f32 to vector<8x128xf32>
    %22 = vector.broadcast %cst_12 : f32 to vector<8x128xf32>
    %23 = arith.select %17, %21, %22 : vector<8x128xi1>, vector<8x128xf32>
    %24 = tpu.iota {dimensions = array<i32: 1>} : vector<8x256xi32>
    %c128_i32 = arith.constant 128 : i32
    %25 = vector.broadcast %c128_i32 : i32 to vector<8x256xi32>
    %26 = arith.cmpi sge, %24, %25 : vector<8x256xi32>
    %c192_i32 = arith.constant 192 : i32
    %27 = vector.broadcast %c192_i32 : i32 to vector<8x256xi32>
    %28 = arith.cmpi slt, %24, %27 : vector<8x256xi32>
    %29 = arith.andi %26, %28 : vector<8x256xi1>
    %cst_13 = arith.constant 2.000000e+00 : f32
    %cst_14 = arith.constant 1.000000e+00 : f32
    %30 = vector.broadcast %cst_13 : f32 to vector<8x256xf32>
    %31 = vector.broadcast %cst_14 : f32 to vector<8x256xf32>
    %32 = arith.select %29, %30, %31 : vector<8x256xi1>, vector<8x256xf32>
    %cst_15 = arith.constant -1.000000e+00 : f32
    %cst_16 = arith.constant 0.000000e+00 : f32
    %33 = vector.broadcast %cst_15 : f32 to vector<8x256xf32>
    %34 = vector.broadcast %cst_16 : f32 to vector<8x256xf32>
    %35 = arith.select %29, %33, %34 : vector<8x256xi1>, vector<8x256xf32>
    %c0_17 = arith.constant 0 : index
    %c0_18 = arith.constant 0 : index
    %c0_19 = arith.constant 0 : index
    %36 = vector.load %arg2[%c0_17, %c0_18, %c0_19] : memref<8x8x16xf32, #tpu.memory_space<vmem>>, vector<8x8x16xf32>
    %37 = vector.shape_cast %36 : vector<8x8x16xf32> to vector<64x16xf32>
    %c0_20 = arith.constant 0 : index
    %c0_21 = arith.constant 0 : index
    %38 = vector.load %arg3[%c0_20, %c0_21] : memref<16x128xf32, #tpu.memory_space<vmem>>, vector<16x128xf32>
    %cst_22 = arith.constant dense<0.000000e+00> : vector<64x128xf32>
    %39 = tpu.matmul %37, %38, %cst_22 {dimension_numbers = #tpu.dot_dimension_numbers<[1], [0], [0], [1], [0, 0, 1, 1], [], []>} : vector<64x16xf32>, vector<16x128xf32>, vector<64x128xf32> -> vector<64x128xf32>
    %c0_23 = arith.constant 0 : index
    %c0_24 = arith.constant 0 : index
    %40 = vector.load %arg4[%c0_23, %c0_24] : memref<1x128xf32, #tpu.memory_space<vmem>>, vector<1x128xf32>
    %41 = vector.broadcast %40 : vector<1x128xf32> to vector<64x128xf32>
    %42 = arith.addf %39, %41 : vector<64x128xf32>
    %c0_25 = arith.constant 0 : index
    %c0_26 = arith.constant 0 : index
    %43 = vector.load %arg23[%c0_25, %c0_26] : memref<64x128xf32, #tpu.memory_space<vmem>>, vector<64x128xf32>
    tpu.vector_store %arg23[%c0_25, %c0_26], %42 {strides = array<i32>} : memref<64x128xf32, #tpu.memory_space<vmem>>, vector<64x128xf32>,
    %c0_27 = arith.constant 0 : index
    %c0_28 = arith.constant 0 : index
    %44 = vector.load %arg24[%c0_27, %c0_28] : memref<8x32xf32, #tpu.memory_space<vmem>>, vector<8x32xf32>
    %c0_29 = arith.constant 0 : index
    %c0_30 = arith.constant 0 : index
    %45 = vector.load %arg25[%c0_29, %c0_30] : memref<8x32xf32, #tpu.memory_space<vmem>>, vector<8x32xf32>
    %c0_31 = arith.constant 0 : index
    %c0_32 = arith.constant 0 : index
    %46 = vector.load %arg26[%c0_31, %c0_32] : memref<8x64xf32, #tpu.memory_space<vmem>>, vector<8x64xf32>
    %c0_33 = arith.constant 0 : index
    %c0_34 = arith.constant 0 : index
    %47 = vector.load %arg27[%c0_33, %c0_34] : memref<8x64xf32, #tpu.memory_space<vmem>>, vector<8x64xf32>
    %c0_35 = arith.constant 0 : index
    %c0_36 = arith.constant 0 : index
    %48 = vector.load %arg28[%c0_35, %c0_36] : memref<8x64xf32, #tpu.memory_space<vmem>>, vector<8x64xf32>
    %c0_i32_37 = arith.constant 0 : i32
    %c8_i32 = arith.constant 8 : i32
    %49 = arith.muli %c0_i32_37, %c8_i32 : i32
    %50 = tpu.assume_multiple %49, 8 : i32
    %51 = arith.index_cast %50 : i32 to index
    %c0_38 = arith.constant 0 : index
    %52 = vector.load %arg23[%51, %c0_38] : memref<64x128xf32, #tpu.memory_space<vmem>>, vector<8x128xf32>
    %cst_39 = arith.constant dense<0.000000e+00> : vector<8x128xf32>
    %53 = tpu.matmul %44, %3, %cst_39 {dimension_numbers = #tpu.dot_dimension_numbers<[1], [0], [0], [1], [0, 0, 1, 1], [], []>} : vector<8x32xf32>, vector<32x128xf32>, vector<8x128xf32> -> vector<8x128xf32>
    %54 = arith.addf %52, %53 : vector<8x128xf32>
    %55 = arith.negf %54 : vector<8x128xf32>
    %56 = math.exp %55 : vector<8x128xf32>
    %cst_40 = arith.constant 1.000000e+00 : f32
    %57 = vector.broadcast %cst_40 : f32 to vector<8x128xf32>
    %58 = arith.addf %57, %56 : vector<8x128xf32>
    %59 = arith.divf %57, %58 : vector<8x128xf32>
    %60 = arith.mulf %59, %20 : vector<8x128xf32>
    %61 = arith.addf %60, %23 : vector<8x128xf32>
    %62 = vector.extract_strided_slice %61 {offsets = [0, 0], sizes = [8, 32], strides = [1, 1]} : vector<8x128xf32> to vector<8x32xf32>
    %63 = vector.extract_strided_slice %61 {offsets = [0, 32], sizes = [8, 32], strides = [1, 1]} : vector<8x128xf32> to vector<8x32xf32>
    %64 = vector.extract_strided_slice %61 {offsets = [0, 64], sizes = [8, 32], strides = [1, 1]} : vector<8x128xf32> to vector<8x32xf32>
    %65 = vector.extract_strided_slice %61 {offsets = [0, 96], sizes = [8, 32], strides = [1, 1]} : vector<8x128xf32> to vector<8x32xf32>
    %66 = arith.mulf %63, %45 : vector<8x32xf32>
    %67 = arith.mulf %62, %64 : vector<8x32xf32>
    %68 = arith.addf %66, %67 : vector<8x32xf32>
    %69 = math.tanh %68 : vector<8x32xf32>
    %70 = arith.mulf %65, %69 : vector<8x32xf32>
    %cst_41 = arith.constant dense<0.000000e+00> : vector<8x256xf32>
    %71 = tpu.matmul %70, %4, %cst_41 {dimension_numbers = #tpu.dot_dimension_numbers<[1], [0], [0], [1], [0, 0, 1, 1], [], []>} : vector<8x32xf32>, vector<32x256xf32>, vector<8x256xf32> -> vector<8x256xf32>
    %cst_42 = arith.constant dense<0.000000e+00> : vector<8x256xf32>
    %72 = tpu.matmul %46, %5, %cst_42 {dimension_numbers = #tpu.dot_dimension_numbers<[1], [0], [0], [1], [0, 0, 1, 1], [], []>} : vector<8x64xf32>, vector<64x256xf32>, vector<8x256xf32> -> vector<8x256xf32>
    %73 = arith.addf %71, %72 : vector<8x256xf32>
    %74 = arith.addf %73, %8 : vector<8x256xf32>
    %75 = arith.negf %74 : vector<8x256xf32>
    %76 = math.exp %75 : vector<8x256xf32>
    %cst_43 = arith.constant 1.000000e+00 : f32
    %77 = vector.broadcast %cst_43 : f32 to vector<8x256xf32>
    %78 = arith.addf %77, %76 : vector<8x256xf32>
    %79 = arith.divf %77, %78 : vector<8x256xf32>
    %80 = arith.mulf %79, %32 : vector<8x256xf32>
    %81 = arith.addf %80, %35 : vector<8x256xf32>
    %82 = vector.extract_strided_slice %81 {offsets = [0, 0], sizes = [8, 64], strides = [1, 1]} : vector<8x256xf32> to vector<8x64xf32>
    %83 = vector.extract_strided_slice %81 {offsets = [0, 64], sizes = [8, 64], strides = [1, 1]} : vector<8x256xf32> to vector<8x64xf32>
    %84 = vector.extract_strided_slice %81 {offsets = [0, 128], sizes = [8, 64], strides = [1, 1]} : vector<8x256xf32> to vector<8x64xf32>
    %85 = vector.extract_strided_slice %81 {offsets = [0, 192], sizes = [8, 64], strides = [1, 1]} : vector<8x256xf32> to vector<8x64xf32>
    %86 = arith.mulf %83, %47 : vector<8x64xf32>
    %87 = arith.mulf %82, %84 : vector<8x64xf32>
    %88 = arith.addf %86, %87 : vector<8x64xf32>
    %89 = math.tanh %88 : vector<8x64xf32>
    %90 = arith.mulf %85, %89 : vector<8x64xf32>
    %91 = arith.mulf %90, %11 : vector<8x64xf32>
    %92 = arith.maximumf %48, %91 : vector<8x64xf32>
    %c1_i32 = arith.constant 1 : i32
    %c8_i32_44 = arith.constant 8 : i32
    %93 = arith.muli %c1_i32, %c8_i32_44 : i32
    %94 = tpu.assume_multiple %93, 8 : i32
    %95 = arith.index_cast %94 : i32 to index
    %c0_45 = arith.constant 0 : index
    %96 = vector.load %arg23[%95, %c0_45] : memref<64x128xf32, #tpu.memory_space<vmem>>, vector<8x128xf32>
    %cst_46 = arith.constant dense<0.000000e+00> : vector<8x128xf32>
    %97 = tpu.matmul %70, %3, %cst_46 {dimension_numbers = #tpu.dot_dimension_numbers<[1], [0], [0], [1], [0, 0, 1, 1], [], []>} : vector<8x32xf32>, vector<32x128xf32>, vector<8x128xf32> -> vector<8x128xf32>
    %98 = arith.addf %96, %97 : vector<8x128xf32>
    %99 = arith.negf %98 : vector<8x128xf32>
    %100 = math.exp %99 : vector<8x128xf32>
    %cst_47 = arith.constant 1.000000e+00 : f32
    %101 = vector.broadcast %cst_47 : f32 to vector<8x128xf32>
    %102 = arith.addf %101, %100 : vector<8x128xf32>
    %103 = arith.divf %101, %102 : vector<8x128xf32>
    %104 = arith.mulf %103, %20 : vector<8x128xf32>
    %105 = arith.addf %104, %23 : vector<8x128xf32>
    %106 = vector.extract_strided_slice %105 {offsets = [0, 0], sizes = [8, 32], strides = [1, 1]} : vector<8x128xf32> to vector<8x32xf32>
    %107 = vector.extract_strided_slice %105 {offsets = [0, 32], sizes = [8, 32], strides = [1, 1]} : vector<8x128xf32> to vector<8x32xf32>
    %108 = vector.extract_strided_slice %105 {offsets = [0, 64], sizes = [8, 32], strides = [1, 1]} : vector<8x128xf32> to vector<8x32xf32>
    %109 = vector.extract_strided_slice %105 {offsets = [0, 96], sizes = [8, 32], strides = [1, 1]} : vector<8x128xf32> to vector<8x32xf32>
    %110 = arith.mulf %107, %68 : vector<8x32xf32>
    %111 = arith.mulf %106, %108 : vector<8x32xf32>
    %112 = arith.addf %110, %111 : vector<8x32xf32>
    %113 = math.tanh %112 : vector<8x32xf32>
    %114 = arith.mulf %109, %113 : vector<8x32xf32>
    %cst_48 = arith.constant dense<0.000000e+00> : vector<8x256xf32>
    %115 = tpu.matmul %114, %4, %cst_48 {dimension_numbers = #tpu.dot_dimension_numbers<[1], [0], [0], [1], [0, 0, 1, 1], [], []>} : vector<8x32xf32>, vector<32x256xf32>, vector<8x256xf32> -> vector<8x256xf32>
    %cst_49 = arith.constant dense<0.000000e+00> : vector<8x256xf32>
    %116 = tpu.matmul %90, %5, %cst_49 {dimension_numbers = #tpu.dot_dimension_numbers<[1], [0], [0], [1], [0, 0, 1, 1], [], []>} : vector<8x64xf32>, vector<64x256xf32>, vector<8x256xf32> -> vector<8x256xf32>
    %117 = arith.addf %115, %116 : vector<8x256xf32>
    %118 = arith.addf %117, %8 : vector<8x256xf32>
    %119 = arith.negf %118 : vector<8x256xf32>
    %120 = math.exp %119 : vector<8x256xf32>
    %cst_50 = arith.constant 1.000000e+00 : f32
    %121 = vector.broadcast %cst_50 : f32 to vector<8x256xf32>
    %122 = arith.addf %121, %120 : vector<8x256xf32>
    %123 = arith.divf %121, %122 : vector<8x256xf32>
    %124 = arith.mulf %123, %32 : vector<8x256xf32>
    %125 = arith.addf %124, %35 : vector<8x256xf32>
    %126 = vector.extract_strided_slice %125 {offsets = [0, 0], sizes = [8, 64], strides = [1, 1]} : vector<8x256xf32> to vector<8x64xf32>
    %127 = vector.extract_strided_slice %125 {offsets = [0, 64], sizes = [8, 64], strides = [1, 1]} : vector<8x256xf32> to vector<8x64xf32>
    %128 = vector.extract_strided_slice %125 {offsets = [0, 128], sizes = [8, 64], strides = [1, 1]} : vector<8x256xf32> to vector<8x64xf32>
    %129 = vector.extract_strided_slice %125 {offsets = [0, 192], sizes = [8, 64], strides = [1, 1]} : vector<8x256xf32> to vector<8x64xf32>
    %130 = arith.mulf %127, %88 : vector<8x64xf32>
    %131 = arith.mulf %126, %128 : vector<8x64xf32>
    %132 = arith.addf %130, %131 : vector<8x64xf32>
    %133 = math.tanh %132 : vector<8x64xf32>
    %134 = arith.mulf %129, %133 : vector<8x64xf32>
    %135 = arith.mulf %134, %11 : vector<8x64xf32>
    %136 = arith.maximumf %92, %135 : vector<8x64xf32>
    %c2_i32 = arith.constant 2 : i32
    %c8_i32_51 = arith.constant 8 : i32
    %137 = arith.muli %c2_i32, %c8_i32_51 : i32
    %138 = tpu.assume_multiple %137, 8 : i32
    %139 = arith.index_cast %138 : i32 to index
    %c0_52 = arith.constant 0 : index
    %140 = vector.load %arg23[%139, %c0_52] : memref<64x128xf32, #tpu.memory_space<vmem>>, vector<8x128xf32>
    %cst_53 = arith.constant dense<0.000000e+00> : vector<8x128xf32>
    %141 = tpu.matmul %114, %3, %cst_53 {dimension_numbers = #tpu.dot_dimension_numbers<[1], [0], [0], [1], [0, 0, 1, 1], [], []>} : vector<8x32xf32>, vector<32x128xf32>, vector<8x128xf32> -> vector<8x128xf32>
    %142 = arith.addf %140, %141 : vector<8x128xf32>
    %143 = arith.negf %142 : vector<8x128xf32>
    %144 = math.exp %143 : vector<8x128xf32>
    %cst_54 = arith.constant 1.000000e+00 : f32
    %145 = vector.broadcast %cst_54 : f32 to vector<8x128xf32>
    %146 = arith.addf %145, %144 : vector<8x128xf32>
    %147 = arith.divf %145, %146 : vector<8x128xf32>
    %148 = arith.mulf %147, %20 : vector<8x128xf32>
    %149 = arith.addf %148, %23 : vector<8x128xf32>
    %150 = vector.extract_strided_slice %149 {offsets = [0, 0], sizes = [8, 32], strides = [1, 1]} : vector<8x128xf32> to vector<8x32xf32>
    %151 = vector.extract_strided_slice %149 {offsets = [0, 32], sizes = [8, 32], strides = [1, 1]} : vector<8x128xf32> to vector<8x32xf32>
    %152 = vector.extract_strided_slice %149 {offsets = [0, 64], sizes = [8, 32], strides = [1, 1]} : vector<8x128xf32> to vector<8x32xf32>
    %153 = vector.extract_strided_slice %149 {offsets = [0, 96], sizes = [8, 32], strides = [1, 1]} : vector<8x128xf32> to vector<8x32xf32>
    %154 = arith.mulf %151, %112 : vector<8x32xf32>
    %155 = arith.mulf %150, %152 : vector<8x32xf32>
    %156 = arith.addf %154, %155 : vector<8x32xf32>
    %157 = math.tanh %156 : vector<8x32xf32>
    %158 = arith.mulf %153, %157 : vector<8x32xf32>
    %cst_55 = arith.constant dense<0.000000e+00> : vector<8x256xf32>
    %159 = tpu.matmul %158, %4, %cst_55 {dimension_numbers = #tpu.dot_dimension_numbers<[1], [0], [0], [1], [0, 0, 1, 1], [], []>} : vector<8x32xf32>, vector<32x256xf32>, vector<8x256xf32> -> vector<8x256xf32>
    %cst_56 = arith.constant dense<0.000000e+00> : vector<8x256xf32>
    %160 = tpu.matmul %134, %5, %cst_56 {dimension_numbers = #tpu.dot_dimension_numbers<[1], [0], [0], [1], [0, 0, 1, 1], [], []>} : vector<8x64xf32>, vector<64x256xf32>, vector<8x256xf32> -> vector<8x256xf32>
    %161 = arith.addf %159, %160 : vector<8x256xf32>
    %162 = arith.addf %161, %8 : vector<8x256xf32>
    %163 = arith.negf %162 : vector<8x256xf32>
    %164 = math.exp %163 : vector<8x256xf32>
    %cst_57 = arith.constant 1.000000e+00 : f32
    %165 = vector.broadcast %cst_57 : f32 to vector<8x256xf32>
    %166 = arith.addf %165, %164 : vector<8x256xf32>
    %167 = arith.divf %165, %166 : vector<8x256xf32>
    %168 = arith.mulf %167, %32 : vector<8x256xf32>
    %169 = arith.addf %168, %35 : vector<8x256xf32>
    %170 = vector.extract_strided_slice %169 {offsets = [0, 0], sizes = [8, 64], strides = [1, 1]} : vector<8x256xf32> to vector<8x64xf32>
    %171 = vector.extract_strided_slice %169 {offsets = [0, 64], sizes = [8, 64], strides = [1, 1]} : vector<8x256xf32> to vector<8x64xf32>
    %172 = vector.extract_strided_slice %169 {offsets = [0, 128], sizes = [8, 64], strides = [1, 1]} : vector<8x256xf32> to vector<8x64xf32>
    %173 = vector.extract_strided_slice %169 {offsets = [0, 192], sizes = [8, 64], strides = [1, 1]} : vector<8x256xf32> to vector<8x64xf32>
    %174 = arith.mulf %171, %132 : vector<8x64xf32>
    %175 = arith.mulf %170, %172 : vector<8x64xf32>
    %176 = arith.addf %174, %175 : vector<8x64xf32>
    %177 = math.tanh %176 : vector<8x64xf32>
    %178 = arith.mulf %173, %177 : vector<8x64xf32>
    %179 = arith.mulf %178, %11 : vector<8x64xf32>
    %180 = arith.maximumf %136, %179 : vector<8x64xf32>
    %c3_i32 = arith.constant 3 : i32
    %c8_i32_58 = arith.constant 8 : i32
    %181 = arith.muli %c3_i32, %c8_i32_58 : i32
    %182 = tpu.assume_multiple %181, 8 : i32
    %183 = arith.index_cast %182 : i32 to index
    %c0_59 = arith.constant 0 : index
    %184 = vector.load %arg23[%183, %c0_59] : memref<64x128xf32, #tpu.memory_space<vmem>>, vector<8x128xf32>
    %cst_60 = arith.constant dense<0.000000e+00> : vector<8x128xf32>
    %185 = tpu.matmul %158, %3, %cst_60 {dimension_numbers = #tpu.dot_dimension_numbers<[1], [0], [0], [1], [0, 0, 1, 1], [], []>} : vector<8x32xf32>, vector<32x128xf32>, vector<8x128xf32> -> vector<8x128xf32>
    %186 = arith.addf %184, %185 : vector<8x128xf32>
    %187 = arith.negf %186 : vector<8x128xf32>
    %188 = math.exp %187 : vector<8x128xf32>
    %cst_61 = arith.constant 1.000000e+00 : f32
    %189 = vector.broadcast %cst_61 : f32 to vector<8x128xf32>
    %190 = arith.addf %189, %188 : vector<8x128xf32>
    %191 = arith.divf %189, %190 : vector<8x128xf32>
    %192 = arith.mulf %191, %20 : vector<8x128xf32>
    %193 = arith.addf %192, %23 : vector<8x128xf32>
    %194 = vector.extract_strided_slice %193 {offsets = [0, 0], sizes = [8, 32], strides = [1, 1]} : vector<8x128xf32> to vector<8x32xf32>
    %195 = vector.extract_strided_slice %193 {offsets = [0, 32], sizes = [8, 32], strides = [1, 1]} : vector<8x128xf32> to vector<8x32xf32>
    %196 = vector.extract_strided_slice %193 {offsets = [0, 64], sizes = [8, 32], strides = [1, 1]} : vector<8x128xf32> to vector<8x32xf32>
    %197 = vector.extract_strided_slice %193 {offsets = [0, 96], sizes = [8, 32], strides = [1, 1]} : vector<8x128xf32> to vector<8x32xf32>
    %198 = arith.mulf %195, %156 : vector<8x32xf32>
    %199 = arith.mulf %194, %196 : vector<8x32xf32>
    %200 = arith.addf %198, %199 : vector<8x32xf32>
    %201 = math.tanh %200 : vector<8x32xf32>
    %202 = arith.mulf %197, %201 : vector<8x32xf32>
    %cst_62 = arith.constant dense<0.000000e+00> : vector<8x256xf32>
    %203 = tpu.matmul %202, %4, %cst_62 {dimension_numbers = #tpu.dot_dimension_numbers<[1], [0], [0], [1], [0, 0, 1, 1], [], []>} : vector<8x32xf32>, vector<32x256xf32>, vector<8x256xf32> -> vector<8x256xf32>
    %cst_63 = arith.constant dense<0.000000e+00> : vector<8x256xf32>
    %204 = tpu.matmul %178, %5, %cst_63 {dimension_numbers = #tpu.dot_dimension_numbers<[1], [0], [0], [1], [0, 0, 1, 1], [], []>} : vector<8x64xf32>, vector<64x256xf32>, vector<8x256xf32> -> vector<8x256xf32>
    %205 = arith.addf %203, %204 : vector<8x256xf32>
    %206 = arith.addf %205, %8 : vector<8x256xf32>
    %207 = arith.negf %206 : vector<8x256xf32>
    %208 = math.exp %207 : vector<8x256xf32>
    %cst_64 = arith.constant 1.000000e+00 : f32
    %209 = vector.broadcast %cst_64 : f32 to vector<8x256xf32>
    %210 = arith.addf %209, %208 : vector<8x256xf32>
    %211 = arith.divf %209, %210 : vector<8x256xf32>
    %212 = arith.mulf %211, %32 : vector<8x256xf32>
    %213 = arith.addf %212, %35 : vector<8x256xf32>
    %214 = vector.extract_strided_slice %213 {offsets = [0, 0], sizes = [8, 64], strides = [1, 1]} : vector<8x256xf32> to vector<8x64xf32>
    %215 = vector.extract_strided_slice %213 {offsets = [0, 64], sizes = [8, 64], strides = [1, 1]} : vector<8x256xf32> to vector<8x64xf32>
    %216 = vector.extract_strided_slice %213 {offsets = [0, 128], sizes = [8, 64], strides = [1, 1]} : vector<8x256xf32> to vector<8x64xf32>
    %217 = vector.extract_strided_slice %213 {offsets = [0, 192], sizes = [8, 64], strides = [1, 1]} : vector<8x256xf32> to vector<8x64xf32>
    %218 = arith.mulf %215, %176 : vector<8x64xf32>
    %219 = arith.mulf %214, %216 : vector<8x64xf32>
    %220 = arith.addf %218, %219 : vector<8x64xf32>
    %221 = math.tanh %220 : vector<8x64xf32>
    %222 = arith.mulf %217, %221 : vector<8x64xf32>
    %223 = arith.mulf %222, %11 : vector<8x64xf32>
    %224 = arith.maximumf %180, %223 : vector<8x64xf32>
    %c4_i32 = arith.constant 4 : i32
    %c8_i32_65 = arith.constant 8 : i32
    %225 = arith.muli %c4_i32, %c8_i32_65 : i32
    %226 = tpu.assume_multiple %225, 8 : i32
    %227 = arith.index_cast %226 : i32 to index
    %c0_66 = arith.constant 0 : index
    %228 = vector.load %arg23[%227, %c0_66] : memref<64x128xf32, #tpu.memory_space<vmem>>, vector<8x128xf32>
    %cst_67 = arith.constant dense<0.000000e+00> : vector<8x128xf32>
    %229 = tpu.matmul %202, %3, %cst_67 {dimension_numbers = #tpu.dot_dimension_numbers<[1], [0], [0], [1], [0, 0, 1, 1], [], []>} : vector<8x32xf32>, vector<32x128xf32>, vector<8x128xf32> -> vector<8x128xf32>
    %230 = arith.addf %228, %229 : vector<8x128xf32>
    %231 = arith.negf %230 : vector<8x128xf32>
    %232 = math.exp %231 : vector<8x128xf32>
    %cst_68 = arith.constant 1.000000e+00 : f32
    %233 = vector.broadcast %cst_68 : f32 to vector<8x128xf32>
    %234 = arith.addf %233, %232 : vector<8x128xf32>
    %235 = arith.divf %233, %234 : vector<8x128xf32>
    %236 = arith.mulf %235, %20 : vector<8x128xf32>
    %237 = arith.addf %236, %23 : vector<8x128xf32>
    %238 = vector.extract_strided_slice %237 {offsets = [0, 0], sizes = [8, 32], strides = [1, 1]} : vector<8x128xf32> to vector<8x32xf32>
    %239 = vector.extract_strided_slice %237 {offsets = [0, 32], sizes = [8, 32], strides = [1, 1]} : vector<8x128xf32> to vector<8x32xf32>
    %240 = vector.extract_strided_slice %237 {offsets = [0, 64], sizes = [8, 32], strides = [1, 1]} : vector<8x128xf32> to vector<8x32xf32>
    %241 = vector.extract_strided_slice %237 {offsets = [0, 96], sizes = [8, 32], strides = [1, 1]} : vector<8x128xf32> to vector<8x32xf32>
    %242 = arith.mulf %239, %200 : vector<8x32xf32>
    %243 = arith.mulf %238, %240 : vector<8x32xf32>
    %244 = arith.addf %242, %243 : vector<8x32xf32>
    %245 = math.tanh %244 : vector<8x32xf32>
    %246 = arith.mulf %241, %245 : vector<8x32xf32>
    %cst_69 = arith.constant dense<0.000000e+00> : vector<8x256xf32>
    %247 = tpu.matmul %246, %4, %cst_69 {dimension_numbers = #tpu.dot_dimension_numbers<[1], [0], [0], [1], [0, 0, 1, 1], [], []>} : vector<8x32xf32>, vector<32x256xf32>, vector<8x256xf32> -> vector<8x256xf32>
    %cst_70 = arith.constant dense<0.000000e+00> : vector<8x256xf32>
    %248 = tpu.matmul %222, %5, %cst_70 {dimension_numbers = #tpu.dot_dimension_numbers<[1], [0], [0], [1], [0, 0, 1, 1], [], []>} : vector<8x64xf32>, vector<64x256xf32>, vector<8x256xf32> -> vector<8x256xf32>
    %249 = arith.addf %247, %248 : vector<8x256xf32>
    %250 = arith.addf %249, %8 : vector<8x256xf32>
    %251 = arith.negf %250 : vector<8x256xf32>
    %252 = math.exp %251 : vector<8x256xf32>
    %cst_71 = arith.constant 1.000000e+00 : f32
    %253 = vector.broadcast %cst_71 : f32 to vector<8x256xf32>
    %254 = arith.addf %253, %252 : vector<8x256xf32>
    %255 = arith.divf %253, %254 : vector<8x256xf32>
    %256 = arith.mulf %255, %32 : vector<8x256xf32>
    %257 = arith.addf %256, %35 : vector<8x256xf32>
    %258 = vector.extract_strided_slice %257 {offsets = [0, 0], sizes = [8, 64], strides = [1, 1]} : vector<8x256xf32> to vector<8x64xf32>
    %259 = vector.extract_strided_slice %257 {offsets = [0, 64], sizes = [8, 64], strides = [1, 1]} : vector<8x256xf32> to vector<8x64xf32>
    %260 = vector.extract_strided_slice %257 {offsets = [0, 128], sizes = [8, 64], strides = [1, 1]} : vector<8x256xf32> to vector<8x64xf32>
    %261 = vector.extract_strided_slice %257 {offsets = [0, 192], sizes = [8, 64], strides = [1, 1]} : vector<8x256xf32> to vector<8x64xf32>
    %262 = arith.mulf %259, %220 : vector<8x64xf32>
    %263 = arith.mulf %258, %260 : vector<8x64xf32>
    %264 = arith.addf %262, %263 : vector<8x64xf32>
    %265 = math.tanh %264 : vector<8x64xf32>
    %266 = arith.mulf %261, %265 : vector<8x64xf32>
    %267 = arith.mulf %266, %11 : vector<8x64xf32>
    %268 = arith.maximumf %224, %267 : vector<8x64xf32>
    %c5_i32 = arith.constant 5 : i32
    %c8_i32_72 = arith.constant 8 : i32
    %269 = arith.muli %c5_i32, %c8_i32_72 : i32
    %270 = tpu.assume_multiple %269, 8 : i32
    %271 = arith.index_cast %270 : i32 to index
    %c0_73 = arith.constant 0 : index
    %272 = vector.load %arg23[%271, %c0_73] : memref<64x128xf32, #tpu.memory_space<vmem>>, vector<8x128xf32>
    %cst_74 = arith.constant dense<0.000000e+00> : vector<8x128xf32>
    %273 = tpu.matmul %246, %3, %cst_74 {dimension_numbers = #tpu.dot_dimension_numbers<[1], [0], [0], [1], [0, 0, 1, 1], [], []>} : vector<8x32xf32>, vector<32x128xf32>, vector<8x128xf32> -> vector<8x128xf32>
    %274 = arith.addf %272, %273 : vector<8x128xf32>
    %275 = arith.negf %274 : vector<8x128xf32>
    %276 = math.exp %275 : vector<8x128xf32>
    %cst_75 = arith.constant 1.000000e+00 : f32
    %277 = vector.broadcast %cst_75 : f32 to vector<8x128xf32>
    %278 = arith.addf %277, %276 : vector<8x128xf32>
    %279 = arith.divf %277, %278 : vector<8x128xf32>
    %280 = arith.mulf %279, %20 : vector<8x128xf32>
    %281 = arith.addf %280, %23 : vector<8x128xf32>
    %282 = vector.extract_strided_slice %281 {offsets = [0, 0], sizes = [8, 32], strides = [1, 1]} : vector<8x128xf32> to vector<8x32xf32>
    %283 = vector.extract_strided_slice %281 {offsets = [0, 32], sizes = [8, 32], strides = [1, 1]} : vector<8x128xf32> to vector<8x32xf32>
    %284 = vector.extract_strided_slice %281 {offsets = [0, 64], sizes = [8, 32], strides = [1, 1]} : vector<8x128xf32> to vector<8x32xf32>
    %285 = vector.extract_strided_slice %281 {offsets = [0, 96], sizes = [8, 32], strides = [1, 1]} : vector<8x128xf32> to vector<8x32xf32>
    %286 = arith.mulf %283, %244 : vector<8x32xf32>
    %287 = arith.mulf %282, %284 : vector<8x32xf32>
    %288 = arith.addf %286, %287 : vector<8x32xf32>
    %289 = math.tanh %288 : vector<8x32xf32>
    %290 = arith.mulf %285, %289 : vector<8x32xf32>
    %cst_76 = arith.constant dense<0.000000e+00> : vector<8x256xf32>
    %291 = tpu.matmul %290, %4, %cst_76 {dimension_numbers = #tpu.dot_dimension_numbers<[1], [0], [0], [1], [0, 0, 1, 1], [], []>} : vector<8x32xf32>, vector<32x256xf32>, vector<8x256xf32> -> vector<8x256xf32>
    %cst_77 = arith.constant dense<0.000000e+00> : vector<8x256xf32>
    %292 = tpu.matmul %266, %5, %cst_77 {dimension_numbers = #tpu.dot_dimension_numbers<[1], [0], [0], [1], [0, 0, 1, 1], [], []>} : vector<8x64xf32>, vector<64x256xf32>, vector<8x256xf32> -> vector<8x256xf32>
    %293 = arith.addf %291, %292 : vector<8x256xf32>
    %294 = arith.addf %293, %8 : vector<8x256xf32>
    %295 = arith.negf %294 : vector<8x256xf32>
    %296 = math.exp %295 : vector<8x256xf32>
    %cst_78 = arith.constant 1.000000e+00 : f32
    %297 = vector.broadcast %cst_78 : f32 to vector<8x256xf32>
    %298 = arith.addf %297, %296 : vector<8x256xf32>
    %299 = arith.divf %297, %298 : vector<8x256xf32>
    %300 = arith.mulf %299, %32 : vector<8x256xf32>
    %301 = arith.addf %300, %35 : vector<8x256xf32>
    %302 = vector.extract_strided_slice %301 {offsets = [0, 0], sizes = [8, 64], strides = [1, 1]} : vector<8x256xf32> to vector<8x64xf32>
    %303 = vector.extract_strided_slice %301 {offsets = [0, 64], sizes = [8, 64], strides = [1, 1]} : vector<8x256xf32> to vector<8x64xf32>
    %304 = vector.extract_strided_slice %301 {offsets = [0, 128], sizes = [8, 64], strides = [1, 1]} : vector<8x256xf32> to vector<8x64xf32>
    %305 = vector.extract_strided_slice %301 {offsets = [0, 192], sizes = [8, 64], strides = [1, 1]} : vector<8x256xf32> to vector<8x64xf32>
    %306 = arith.mulf %303, %264 : vector<8x64xf32>
    %307 = arith.mulf %302, %304 : vector<8x64xf32>
    %308 = arith.addf %306, %307 : vector<8x64xf32>
    %309 = math.tanh %308 : vector<8x64xf32>
    %310 = arith.mulf %305, %309 : vector<8x64xf32>
    %311 = arith.mulf %310, %11 : vector<8x64xf32>
    %312 = arith.maximumf %268, %311 : vector<8x64xf32>
    %c6_i32 = arith.constant 6 : i32
    %c8_i32_79 = arith.constant 8 : i32
    %313 = arith.muli %c6_i32, %c8_i32_79 : i32
    %314 = tpu.assume_multiple %313, 8 : i32
    %315 = arith.index_cast %314 : i32 to index
    %c0_80 = arith.constant 0 : index
    %316 = vector.load %arg23[%315, %c0_80] : memref<64x128xf32, #tpu.memory_space<vmem>>, vector<8x128xf32>
    %cst_81 = arith.constant dense<0.000000e+00> : vector<8x128xf32>
    %317 = tpu.matmul %290, %3, %cst_81 {dimension_numbers = #tpu.dot_dimension_numbers<[1], [0], [0], [1], [0, 0, 1, 1], [], []>} : vector<8x32xf32>, vector<32x128xf32>, vector<8x128xf32> -> vector<8x128xf32>
    %318 = arith.addf %316, %317 : vector<8x128xf32>
    %319 = arith.negf %318 : vector<8x128xf32>
    %320 = math.exp %319 : vector<8x128xf32>
    %cst_82 = arith.constant 1.000000e+00 : f32
    %321 = vector.broadcast %cst_82 : f32 to vector<8x128xf32>
    %322 = arith.addf %321, %320 : vector<8x128xf32>
    %323 = arith.divf %321, %322 : vector<8x128xf32>
    %324 = arith.mulf %323, %20 : vector<8x128xf32>
    %325 = arith.addf %324, %23 : vector<8x128xf32>
    %326 = vector.extract_strided_slice %325 {offsets = [0, 0], sizes = [8, 32], strides = [1, 1]} : vector<8x128xf32> to vector<8x32xf32>
    %327 = vector.extract_strided_slice %325 {offsets = [0, 32], sizes = [8, 32], strides = [1, 1]} : vector<8x128xf32> to vector<8x32xf32>
    %328 = vector.extract_strided_slice %325 {offsets = [0, 64], sizes = [8, 32], strides = [1, 1]} : vector<8x128xf32> to vector<8x32xf32>
    %329 = vector.extract_strided_slice %325 {offsets = [0, 96], sizes = [8, 32], strides = [1, 1]} : vector<8x128xf32> to vector<8x32xf32>
    %330 = arith.mulf %327, %288 : vector<8x32xf32>
    %331 = arith.mulf %326, %328 : vector<8x32xf32>
    %332 = arith.addf %330, %331 : vector<8x32xf32>
    %333 = math.tanh %332 : vector<8x32xf32>
    %334 = arith.mulf %329, %333 : vector<8x32xf32>
    %cst_83 = arith.constant dense<0.000000e+00> : vector<8x256xf32>
    %335 = tpu.matmul %334, %4, %cst_83 {dimension_numbers = #tpu.dot_dimension_numbers<[1], [0], [0], [1], [0, 0, 1, 1], [], []>} : vector<8x32xf32>, vector<32x256xf32>, vector<8x256xf32> -> vector<8x256xf32>
    %cst_84 = arith.constant dense<0.000000e+00> : vector<8x256xf32>
    %336 = tpu.matmul %310, %5, %cst_84 {dimension_numbers = #tpu.dot_dimension_numbers<[1], [0], [0], [1], [0, 0, 1, 1], [], []>} : vector<8x64xf32>, vector<64x256xf32>, vector<8x256xf32> -> vector<8x256xf32>
    %337 = arith.addf %335, %336 : vector<8x256xf32>
    %338 = arith.addf %337, %8 : vector<8x256xf32>
    %339 = arith.negf %338 : vector<8x256xf32>
    %340 = math.exp %339 : vector<8x256xf32>
    %cst_85 = arith.constant 1.000000e+00 : f32
    %341 = vector.broadcast %cst_85 : f32 to vector<8x256xf32>
    %342 = arith.addf %341, %340 : vector<8x256xf32>
    %343 = arith.divf %341, %342 : vector<8x256xf32>
    %344 = arith.mulf %343, %32 : vector<8x256xf32>
    %345 = arith.addf %344, %35 : vector<8x256xf32>
    %346 = vector.extract_strided_slice %345 {offsets = [0, 0], sizes = [8, 64], strides = [1, 1]} : vector<8x256xf32> to vector<8x64xf32>
    %347 = vector.extract_strided_slice %345 {offsets = [0, 64], sizes = [8, 64], strides = [1, 1]} : vector<8x256xf32> to vector<8x64xf32>
    %348 = vector.extract_strided_slice %345 {offsets = [0, 128], sizes = [8, 64], strides = [1, 1]} : vector<8x256xf32> to vector<8x64xf32>
    %349 = vector.extract_strided_slice %345 {offsets = [0, 192], sizes = [8, 64], strides = [1, 1]} : vector<8x256xf32> to vector<8x64xf32>
    %350 = arith.mulf %347, %308 : vector<8x64xf32>
    %351 = arith.mulf %346, %348 : vector<8x64xf32>
    %352 = arith.addf %350, %351 : vector<8x64xf32>
    %353 = math.tanh %352 : vector<8x64xf32>
    %354 = arith.mulf %349, %353 : vector<8x64xf32>
    %355 = arith.mulf %354, %11 : vector<8x64xf32>
    %356 = arith.maximumf %312, %355 : vector<8x64xf32>
    %c7_i32 = arith.constant 7 : i32
    %c8_i32_86 = arith.constant 8 : i32
    %357 = arith.muli %c7_i32, %c8_i32_86 : i32
    %358 = tpu.assume_multiple %357, 8 : i32
    %359 = arith.index_cast %358 : i32 to index
    %c0_87 = arith.constant 0 : index
    %360 = vector.load %arg23[%359, %c0_87] : memref<64x128xf32, #tpu.memory_space<vmem>>, vector<8x128xf32>
    %cst_88 = arith.constant dense<0.000000e+00> : vector<8x128xf32>
    %361 = tpu.matmul %334, %3, %cst_88 {dimension_numbers = #tpu.dot_dimension_numbers<[1], [0], [0], [1], [0, 0, 1, 1], [], []>} : vector<8x32xf32>, vector<32x128xf32>, vector<8x128xf32> -> vector<8x128xf32>
    %362 = arith.addf %360, %361 : vector<8x128xf32>
    %363 = arith.negf %362 : vector<8x128xf32>
    %364 = math.exp %363 : vector<8x128xf32>
    %cst_89 = arith.constant 1.000000e+00 : f32
    %365 = vector.broadcast %cst_89 : f32 to vector<8x128xf32>
    %366 = arith.addf %365, %364 : vector<8x128xf32>
    %367 = arith.divf %365, %366 : vector<8x128xf32>
    %368 = arith.mulf %367, %20 : vector<8x128xf32>
    %369 = arith.addf %368, %23 : vector<8x128xf32>
    %370 = vector.extract_strided_slice %369 {offsets = [0, 0], sizes = [8, 32], strides = [1, 1]} : vector<8x128xf32> to vector<8x32xf32>
    %371 = vector.extract_strided_slice %369 {offsets = [0, 32], sizes = [8, 32], strides = [1, 1]} : vector<8x128xf32> to vector<8x32xf32>
    %372 = vector.extract_strided_slice %369 {offsets = [0, 64], sizes = [8, 32], strides = [1, 1]} : vector<8x128xf32> to vector<8x32xf32>
    %373 = vector.extract_strided_slice %369 {offsets = [0, 96], sizes = [8, 32], strides = [1, 1]} : vector<8x128xf32> to vector<8x32xf32>
    %374 = arith.mulf %371, %332 : vector<8x32xf32>
    %375 = arith.mulf %370, %372 : vector<8x32xf32>
    %376 = arith.addf %374, %375 : vector<8x32xf32>
    %377 = math.tanh %376 : vector<8x32xf32>
    %378 = arith.mulf %373, %377 : vector<8x32xf32>
    %cst_90 = arith.constant dense<0.000000e+00> : vector<8x256xf32>
    %379 = tpu.matmul %378, %4, %cst_90 {dimension_numbers = #tpu.dot_dimension_numbers<[1], [0], [0], [1], [0, 0, 1, 1], [], []>} : vector<8x32xf32>, vector<32x256xf32>, vector<8x256xf32> -> vector<8x256xf32>
    %cst_91 = arith.constant dense<0.000000e+00> : vector<8x256xf32>
    %380 = tpu.matmul %354, %5, %cst_91 {dimension_numbers = #tpu.dot_dimension_numbers<[1], [0], [0], [1], [0, 0, 1, 1], [], []>} : vector<8x64xf32>, vector<64x256xf32>, vector<8x256xf32> -> vector<8x256xf32>
    %381 = arith.addf %379, %380 : vector<8x256xf32>
    %382 = arith.addf %381, %8 : vector<8x256xf32>
    %383 = arith.negf %382 : vector<8x256xf32>
    %384 = math.exp %383 : vector<8x256xf32>
    %cst_92 = arith.constant 1.000000e+00 : f32
    %385 = vector.broadcast %cst_92 : f32 to vector<8x256xf32>
    %386 = arith.addf %385, %384 : vector<8x256xf32>
    %387 = arith.divf %385, %386 : vector<8x256xf32>
    %388 = arith.mulf %387, %32 : vector<8x256xf32>
    %389 = arith.addf %388, %35 : vector<8x256xf32>
    %390 = vector.extract_strided_slice %389 {offsets = [0, 0], sizes = [8, 64], strides = [1, 1]} : vector<8x256xf32> to vector<8x64xf32>
    %391 = vector.extract_strided_slice %389 {offsets = [0, 64], sizes = [8, 64], strides = [1, 1]} : vector<8x256xf32> to vector<8x64xf32>
    %392 = vector.extract_strided_slice %389 {offsets = [0, 128], sizes = [8, 64], strides = [1, 1]} : vector<8x256xf32> to vector<8x64xf32>
    %393 = vector.extract_strided_slice %389 {offsets = [0, 192], sizes = [8, 64], strides = [1, 1]} : vector<8x256xf32> to vector<8x64xf32>
    %394 = arith.mulf %391, %352 : vector<8x64xf32>
    %395 = arith.mulf %390, %392 : vector<8x64xf32>
    %396 = arith.addf %394, %395 : vector<8x64xf32>
    %397 = math.tanh %396 : vector<8x64xf32>
    %398 = arith.mulf %393, %397 : vector<8x64xf32>
    %399 = arith.mulf %398, %11 : vector<8x64xf32>
    %400 = arith.maximumf %356, %399 : vector<8x64xf32>
    %c8_i32_93 = arith.constant 8 : i32
    %c0_94 = arith.constant 0 : index
    %c0_95 = arith.constant 0 : index
    %401 = vector.load %arg24[%c0_94, %c0_95] : memref<8x32xf32, #tpu.memory_space<vmem>>, vector<8x32xf32>
    tpu.vector_store %arg24[%c0_94, %c0_95], %378 {strides = array<i32>} : memref<8x32xf32, #tpu.memory_space<vmem>>, vector<8x32xf32>,
    %c0_96 = arith.constant 0 : index
    %c0_97 = arith.constant 0 : index
    %402 = vector.load %arg25[%c0_96, %c0_97] : memref<8x32xf32, #tpu.memory_space<vmem>>, vector<8x32xf32>
    tpu.vector_store %arg25[%c0_96, %c0_97], %376 {strides = array<i32>} : memref<8x32xf32, #tpu.memory_space<vmem>>, vector<8x32xf32>,
    %c0_98 = arith.constant 0 : index
    %c0_99 = arith.constant 0 : index
    %403 = vector.load %arg26[%c0_98, %c0_99] : memref<8x64xf32, #tpu.memory_space<vmem>>, vector<8x64xf32>
    tpu.vector_store %arg26[%c0_98, %c0_99], %398 {strides = array<i32>} : memref<8x64xf32, #tpu.memory_space<vmem>>, vector<8x64xf32>,
    %c0_100 = arith.constant 0 : index
    %c0_101 = arith.constant 0 : index
    %404 = vector.load %arg27[%c0_100, %c0_101] : memref<8x64xf32, #tpu.memory_space<vmem>>, vector<8x64xf32>
    tpu.vector_store %arg27[%c0_100, %c0_101], %396 {strides = array<i32>} : memref<8x64xf32, #tpu.memory_space<vmem>>, vector<8x64xf32>,
    %c0_102 = arith.constant 0 : index
    %c0_103 = arith.constant 0 : index
    %405 = vector.load %arg28[%c0_102, %c0_103] : memref<8x64xf32, #tpu.memory_space<vmem>>, vector<8x64xf32>
    tpu.vector_store %arg28[%c0_102, %c0_103], %400 {strides = array<i32>} : memref<8x64xf32, #tpu.memory_space<vmem>>, vector<8x64xf32>,
    %c1_i32_104 = arith.constant 1 : i32
    %406 = arith.cmpi eq, %arg1, %c1_i32_104 : i32
    %407 = arith.extui %406 : i1 to i32
    %c0_i32_105 = arith.constant 0 : i32
    %408 = arith.cmpi ne, %407, %c0_i32_105 : i32
    scf.if %408 {
      %c0_106 = arith.constant 0 : index
      %c0_107 = arith.constant 0 : index
      %409 = vector.load %arg10[%c0_106, %c0_107] : memref<1x64xf32, #tpu.memory_space<vmem>>, vector<1x64xf32>
      %410 = vector.broadcast %409 : vector<1x64xf32> to vector<8x64xf32>
      %411 = arith.addf %400, %410 : vector<8x64xf32>
      %412 = vector.extract_strided_slice %411 {offsets = [0, 0], sizes = [8, 32], strides = [1, 1]} : vector<8x64xf32> to vector<8x32xf32>
      %413 = vector.extract_strided_slice %411 {offsets = [0, 32], sizes = [8, 32], strides = [1, 1]} : vector<8x64xf32> to vector<8x32xf32>
      %c0_108 = arith.constant 0 : index
      %c0_109 = arith.constant 0 : index
      %414 = vector.load %arg11[%c0_108, %c0_109] : memref<8x15xf32, #tpu.memory_space<vmem>>, vector<8x15xf32>
      %c0_110 = arith.constant 0 : index
      %c0_111 = arith.constant 0 : index
      %415 = vector.load %arg12[%c0_110, %c0_111] : memref<32x6xf32, #tpu.memory_space<vmem>>, vector<32x6xf32>
      %cst_112 = arith.constant dense<0.000000e+00> : vector<8x6xf32>
      %416 = tpu.matmul %412, %415, %cst_112 {dimension_numbers = #tpu.dot_dimension_numbers<[1], [0], [0], [1], [0, 0, 1, 1], [], []>} : vector<8x32xf32>, vector<32x6xf32>, vector<8x6xf32> -> vector<8x6xf32>
      %c0_113 = arith.constant 0 : index
      %c0_114 = arith.constant 0 : index
      %417 = vector.load %arg13[%c0_113, %c0_114] : memref<15x6xf32, #tpu.memory_space<vmem>>, vector<15x6xf32>
      %cst_115 = arith.constant dense<0.000000e+00> : vector<8x6xf32>
      %418 = tpu.matmul %414, %417, %cst_115 {dimension_numbers = #tpu.dot_dimension_numbers<[1], [0], [0], [1], [0, 0, 1, 1], [], []>} : vector<8x15xf32>, vector<15x6xf32>, vector<8x6xf32> -> vector<8x6xf32>
      %419 = arith.addf %416, %418 : vector<8x6xf32>
      %c0_116 = arith.constant 0 : index
      %c0_117 = arith.constant 0 : index
      %420 = vector.load %arg14[%c0_116, %c0_117] : memref<1x6xf32, #tpu.memory_space<vmem>>, vector<1x6xf32>
      %421 = vector.broadcast %420 : vector<1x6xf32> to vector<8x6xf32>
      %422 = arith.addf %419, %421 : vector<8x6xf32>
      %423 = tpu.iota {dimensions = array<i32: 1>} : vector<8x6xi32>
      %cst_118 = arith.constant dense<0xFF800000> : vector<8xf32>
      %424 = vector.multi_reduction <maximumf>, %422, %cst_118 [1] : vector<8x6xf32> to vector<8xf32>
      %425 = vector.shape_cast %424 : vector<8xf32> to vector<8x1xf32>
      %426 = vector.broadcast %425 : vector<8x1xf32> to vector<8x6xf32>
      %427 = arith.cmpf oeq, %422, %426 : vector<8x6xf32>
      %c6_i32_119 = arith.constant 6 : i32
      %428 = vector.broadcast %c6_i32_119 : i32 to vector<8x6xi32>
      %429 = arith.select %427, %423, %428 : vector<8x6xi1>, vector<8x6xi32>
      %cst_120 = arith.constant dense<2147483647> : vector<8xi32>
      %430 = vector.multi_reduction <minsi>, %429, %cst_120 [1] : vector<8x6xi32> to vector<8xi32>
      %431 = vector.shape_cast %430 : vector<8xi32> to vector<8x1xi32>
      %432 = vector.broadcast %431 : vector<8x1xi32> to vector<8x6xi32>
      %433 = arith.cmpi eq, %423, %432 : vector<8x6xi32>
      %434 = arith.extui %433 : vector<8x6xi1> to vector<8x6xi32>
      %435 = arith.sitofp %434 : vector<8x6xi32> to vector<8x6xf32>
      %c0_121 = arith.constant 0 : index
      %c0_122 = arith.constant 0 : index
      %436 = vector.load %arg15[%c0_121, %c0_122] : memref<32x8xf32, #tpu.memory_space<vmem>>, vector<32x8xf32>
      %cst_123 = arith.constant dense<0.000000e+00> : vector<8x8xf32>
      %437 = tpu.matmul %413, %436, %cst_123 {dimension_numbers = #tpu.dot_dimension_numbers<[1], [0], [0], [1], [0, 0, 1, 1], [], []>} : vector<8x32xf32>, vector<32x8xf32>, vector<8x8xf32> -> vector<8x8xf32>
      %c0_124 = arith.constant 0 : index
      %c0_125 = arith.constant 0 : index
      %438 = vector.load %arg16[%c0_124, %c0_125] : memref<15x8xf32, #tpu.memory_space<vmem>>, vector<15x8xf32>
      %cst_126 = arith.constant dense<0.000000e+00> : vector<8x8xf32>
      %439 = tpu.matmul %414, %438, %cst_126 {dimension_numbers = #tpu.dot_dimension_numbers<[1], [0], [0], [1], [0, 0, 1, 1], [], []>} : vector<8x15xf32>, vector<15x8xf32>, vector<8x8xf32> -> vector<8x8xf32>
      %440 = arith.addf %437, %439 : vector<8x8xf32>
      %c0_127 = arith.constant 0 : index
      %c0_128 = arith.constant 0 : index
      %441 = vector.load %arg17[%c0_127, %c0_128] : memref<6x8xf32, #tpu.memory_space<vmem>>, vector<6x8xf32>
      %cst_129 = arith.constant dense<0.000000e+00> : vector<8x8xf32>
      %442 = tpu.matmul %435, %441, %cst_129 {dimension_numbers = #tpu.dot_dimension_numbers<[1], [0], [0], [1], [0, 0, 1, 1], [], []>} : vector<8x6xf32>, vector<6x8xf32>, vector<8x8xf32> -> vector<8x8xf32>
      %443 = arith.addf %440, %442 : vector<8x8xf32>
      %c0_130 = arith.constant 0 : index
      %c0_131 = arith.constant 0 : index
      %444 = vector.load %arg18[%c0_130, %c0_131] : memref<1x8xf32, #tpu.memory_space<vmem>>, vector<1x8xf32>
      %445 = vector.broadcast %444 : vector<1x8xf32> to vector<8x8xf32>
      %446 = arith.addf %443, %445 : vector<8x8xf32>
      %c0_132 = arith.constant 0 : index
      %c0_133 = arith.constant 0 : index
      %447 = vector.load %arg19[%c0_132, %c0_133] : memref<6x10xf32, #tpu.memory_space<vmem>>, vector<6x10xf32>
      %cst_134 = arith.constant dense<0.000000e+00> : vector<8x10xf32>
      %448 = tpu.matmul %422, %447, %cst_134 {dimension_numbers = #tpu.dot_dimension_numbers<[1], [0], [0], [1], [0, 0, 1, 1], [], []>} : vector<8x6xf32>, vector<6x10xf32>, vector<8x10xf32> -> vector<8x10xf32>
      %c0_135 = arith.constant 0 : index
      %c0_136 = arith.constant 0 : index
      %449 = vector.load %arg20[%c0_135, %c0_136] : memref<8x10xf32, #tpu.memory_space<vmem>>, vector<8x10xf32>
      %cst_137 = arith.constant dense<0.000000e+00> : vector<8x10xf32>
      %450 = tpu.matmul %446, %449, %cst_137 {dimension_numbers = #tpu.dot_dimension_numbers<[1], [0], [0], [1], [0, 0, 1, 1], [], []>} : vector<8x8xf32>, vector<8x10xf32>, vector<8x10xf32> -> vector<8x10xf32>
      %451 = arith.addf %448, %450 : vector<8x10xf32>
      %c0_138 = arith.constant 0 : index
      %c0_139 = arith.constant 0 : index
      %452 = vector.load %arg21[%c0_138, %c0_139] : memref<1x10xf32, #tpu.memory_space<vmem>>, vector<1x10xf32>
      %453 = vector.broadcast %452 : vector<1x10xf32> to vector<8x10xf32>
      %454 = arith.addf %451, %453 : vector<8x10xf32>
      %cst_140 = arith.constant 0.000000e+00 : f32
      %455 = vector.broadcast %cst_140 : f32 to vector<8x104xf32>
      %456 = tpu.concatenate %422, %446, %454, %455 in 1 : vector<8x6xf32>, vector<8x8xf32>, vector<8x10xf32>, vector<8x104xf32> -> vector<8x128xf32>
      %c0_141 = arith.constant 0 : index
      %c0_142 = arith.constant 0 : index
      %457 = vector.load %arg22[%c0_141, %c0_142] : memref<8x128xf32, #tpu.memory_space<vmem>>, vector<8x128xf32>
      tpu.vector_store %arg22[%c0_141, %c0_142], %456 {strides = array<i32>} : memref<8x128xf32, #tpu.memory_space<vmem>>, vector<8x128xf32>,
    } else {
    }
    return
  }
  func.func @transform_0(%arg0: i32, %arg1: i32) -> (i32, i32, i32) {
    %c0_i32 = arith.constant 0 : i32
    %c0_i32_0 = arith.constant 0 : i32
    return %arg1, %arg0, %c0_i32 : i32, i32, i32
  }
  func.func @transform_1(%arg0: i32, %arg1: i32) -> (i32, i32) {
    %c0_i32 = arith.constant 0 : i32
    %c0_i32_0 = arith.constant 0 : i32
    %c0_i32_1 = arith.constant 0 : i32
    return %c0_i32, %c0_i32_0 : i32, i32
  }
  func.func @transform_2(%arg0: i32, %arg1: i32) -> (i32, i32) {
    %c0_i32 = arith.constant 0 : i32
    %c0_i32_0 = arith.constant 0 : i32
    %c0_i32_1 = arith.constant 0 : i32
    return %c0_i32, %c0_i32_0 : i32, i32
  }
  func.func @transform_3(%arg0: i32, %arg1: i32) -> (i32, i32) {
    %c0_i32 = arith.constant 0 : i32
    %c0_i32_0 = arith.constant 0 : i32
    %c0_i32_1 = arith.constant 0 : i32
    return %c0_i32, %c0_i32_0 : i32, i32
  }
  func.func @transform_4(%arg0: i32, %arg1: i32) -> (i32, i32) {
    %c0_i32 = arith.constant 0 : i32
    %c0_i32_0 = arith.constant 0 : i32
    %c0_i32_1 = arith.constant 0 : i32
    return %c0_i32, %c0_i32_0 : i32, i32
  }
  func.func @transform_5(%arg0: i32, %arg1: i32) -> (i32, i32) {
    %c0_i32 = arith.constant 0 : i32
    %c0_i32_0 = arith.constant 0 : i32
    %c0_i32_1 = arith.constant 0 : i32
    return %c0_i32, %c0_i32_0 : i32, i32
  }
  func.func @transform_6(%arg0: i32, %arg1: i32) -> (i32, i32) {
    %c0_i32 = arith.constant 0 : i32
    %c0_i32_0 = arith.constant 0 : i32
    %c0_i32_1 = arith.constant 0 : i32
    return %c0_i32, %c0_i32_0 : i32, i32
  }
  func.func @transform_7(%arg0: i32, %arg1: i32) -> (i32, i32) {
    %c0_i32 = arith.constant 0 : i32
    %c0_i32_0 = arith.constant 0 : i32
    %c0_i32_1 = arith.constant 0 : i32
    return %c0_i32, %c0_i32_0 : i32, i32
  }
  func.func @transform_8(%arg0: i32, %arg1: i32) -> (i32, i32) {
    %c0_i32 = arith.constant 0 : i32
    %c0_i32_0 = arith.constant 0 : i32
    %c0_i32_1 = arith.constant 0 : i32
    return %c0_i32, %c0_i32_0 : i32, i32
  }
  func.func @transform_9(%arg0: i32, %arg1: i32) -> (i32, i32) {
    %c0_i32 = arith.constant 0 : i32
    %c0_i32_0 = arith.constant 0 : i32
    return %arg0, %c0_i32 : i32, i32
  }
  func.func @transform_10(%arg0: i32, %arg1: i32) -> (i32, i32) {
    %c0_i32 = arith.constant 0 : i32
    %c0_i32_0 = arith.constant 0 : i32
    %c0_i32_1 = arith.constant 0 : i32
    return %c0_i32, %c0_i32_0 : i32, i32
  }
  func.func @transform_11(%arg0: i32, %arg1: i32) -> (i32, i32) {
    %c0_i32 = arith.constant 0 : i32
    %c0_i32_0 = arith.constant 0 : i32
    %c0_i32_1 = arith.constant 0 : i32
    return %c0_i32, %c0_i32_0 : i32, i32
  }
  func.func @transform_12(%arg0: i32, %arg1: i32) -> (i32, i32) {
    %c0_i32 = arith.constant 0 : i32
    %c0_i32_0 = arith.constant 0 : i32
    %c0_i32_1 = arith.constant 0 : i32
    return %c0_i32, %c0_i32_0 : i32, i32
  }
  func.func @transform_13(%arg0: i32, %arg1: i32) -> (i32, i32) {
    %c0_i32 = arith.constant 0 : i32
    %c0_i32_0 = arith.constant 0 : i32
    %c0_i32_1 = arith.constant 0 : i32
    return %c0_i32, %c0_i32_0 : i32, i32
  }
  func.func @transform_14(%arg0: i32, %arg1: i32) -> (i32, i32) {
    %c0_i32 = arith.constant 0 : i32
    %c0_i32_0 = arith.constant 0 : i32
    %c0_i32_1 = arith.constant 0 : i32
    return %c0_i32, %c0_i32_0 : i32, i32
  }
  func.func @transform_15(%arg0: i32, %arg1: i32) -> (i32, i32) {
    %c0_i32 = arith.constant 0 : i32
    %c0_i32_0 = arith.constant 0 : i32
    %c0_i32_1 = arith.constant 0 : i32
    return %c0_i32, %c0_i32_0 : i32, i32
  }
  func.func @transform_16(%arg0: i32, %arg1: i32) -> (i32, i32) {
    %c0_i32 = arith.constant 0 : i32
    %c0_i32_0 = arith.constant 0 : i32
    %c0_i32_1 = arith.constant 0 : i32
    return %c0_i32, %c0_i32_0 : i32, i32
  }
  func.func @transform_17(%arg0: i32, %arg1: i32) -> (i32, i32) {
    %c0_i32 = arith.constant 0 : i32
    %c0_i32_0 = arith.constant 0 : i32
    %c0_i32_1 = arith.constant 0 : i32
    return %c0_i32, %c0_i32_0 : i32, i32
  }
  func.func @transform_18(%arg0: i32, %arg1: i32) -> (i32, i32) {
    %c0_i32 = arith.constant 0 : i32
    %c0_i32_0 = arith.constant 0 : i32
    %c0_i32_1 = arith.constant 0 : i32
    return %c0_i32, %c0_i32_0 : i32, i32
  }
  func.func @transform_19(%arg0: i32, %arg1: i32) -> (i32, i32) {
    %c0_i32 = arith.constant 0 : i32
    %c0_i32_0 = arith.constant 0 : i32
    %c0_i32_1 = arith.constant 0 : i32
    return %c0_i32, %c0_i32_0 : i32, i32
  }
  func.func @transform_20(%arg0: i32, %arg1: i32) -> (i32, i32) {
    %c0_i32 = arith.constant 0 : i32
    %c0_i32_0 = arith.constant 0 : i32
    return %arg0, %c0_i32 : i32, i32
  }
}

</mosaic_0001>

<bundles_post_ra>
// kernel: forward.1
= control target key start
LH: loop header
LB: loop body
LE: loop exit
PB: predicated region body
PF: predicated region fallthrough
CT: control target
= control target key end

     0   :  { %s4801_s22 = smov 0   ;;  %s4803_s23 = smov 0   ;;  %s5520_s0 = inlined_call_operand.vmem [shape: f32[16,8,16], index: 0, kind: input, shape index: {}]   ;;  %s5521_s1 = inlined_call_operand.vmem [shape: f32[16,128], index: 1, kind: input, shape index: {}]   ;;  %s5522_s2 = inlined_call_operand.vmem [shape: f32[1,128], index: 2, kind: input, shape index: {}]   ;;  %s5523_s3 = inlined_call_operand.vmem [shape: f32[32,128], index: 3, kind: input, shape index: {}]   ;;  %s5524_s4 = inlined_call_operand.vmem [shape: f32[32,256], index: 4, kind: input, shape index: {}]   ;;  %s5525_s5 = inlined_call_operand.vmem [shape: f32[64,256], index: 5, kind: input, shape index: {}]   ;;  %s5526_s6 = inlined_call_operand.vmem [shape: f32[1,256], index: 6, kind: input, shape index: {}]   ;;  %s5527_s7 = inlined_call_operand.vmem [shape: f32[1,64], index: 7, kind: input, shape index: {}]   ;;  %s5528_s8 = inlined_call_operand.vmem [shape: f32[1,64], index: 8, kind: input, shape index: {}]   ;;  %s5529_s9 = inlined_call_operand.vmem [shape: f32[8,15], index: 9, kind: input, shape index: {}]   ;;  %s5530_s10 = inlined_call_operand.vmem [shape: f32[32,6], index: 10, kind: input, shape index: {}]   ;;  %s5531_s11 = inlined_call_operand.vmem [shape: f32[15,6], index: 11, kind: input, shape index: {}]   ;;  %s5532_s12 = inlined_call_operand.vmem [shape: f32[1,6], index: 12, kind: input, shape index: {}]   ;;  %s5533_s13 = inlined_call_operand.vmem [shape: f32[32,8], index: 13, kind: input, shape index: {}]   ;;  %s5534_s14 = inlined_call_operand.vmem [shape: f32[15,8], index: 14, kind: input, shape index: {}]   ;;  %s5535_s15 = inlined_call_operand.vmem [shape: f32[6,8], index: 15, kind: input, shape index: {}]   ;;  %s5536_s16 = inlined_call_operand.vmem [shape: f32[1,8], index: 16, kind: input, shape index: {}]   ;;  %s5537_s17 = inlined_call_operand.vmem [shape: f32[6,10], index: 17, kind: input, shape index: {}]   ;;  %s5538_s18 = inlined_call_operand.vmem [shape: f32[8,10], index: 18, kind: input, shape index: {}]   ;;  %s5539_s19 = inlined_call_operand.vmem [shape: f32[1,10], index: 19, kind: input, shape index: {}]   ;;  %s5540_s20 = inlined_call_operand.vmem [shape: f32[8,128], index: 20, kind: output, shape index: {}]  }
   0x1   :  { %5551 = sst [smem:[#allocation8_spill]] %s5520_s0 }
   0x2   :  { %5552 = sst [smem:[#allocation9_spill]] %s5521_s1  ;;  %s4799_s1 = smov 0  }
   0x3   :  { %5553 = sst [smem:[#allocation10_spill]] %s5522_s2 }
   0x4   :  { %5554 = sst [smem:[#allocation11_spill]] %s5523_s3 }
   0x5   :  { %5555 = sst [smem:[#allocation12_spill]] %s5524_s4 }
   0x6 LB: > { %s39_s24 = sadd.s32 1, %s4672_s22  ;;  %p3896_p0 = scmp.ge.s32.totalorder %s4676_s23, 1  ;;  %s4676_s23 = sphi %s4803_s23, %s30_s23   ;;  %s4672_s22 = sphi %s4801_s22, %s5566_s22   ;;  %s4668_s1 = sphi %s4799_s1, %s5565_s1  }
   0x7   : > { %p40_p1 = scmp.ge.s32.totalorder %s39_s24, 2  ;;  %p589_p2 = scmp.lt.s32.totalorder %s4676_s23, 3 }
   0x9   : > { %s5568_s24 = smov (%p40_p1, %s39_s24), 0  ;;  %p590_p3 = pnand %p3896_p0, %p589_p2 }
   0xa   : > { %s3897_s2 = sshll.u32 (!%p590_p3), %s4668_s1, 3  ;;  %s5556_s27 = sld [smem:[#allocation8_spill]] (!%p590_p3) }
   0xb   : > { %593 = sbr.rel (%p590_p3) target bundleno = 7524 (0x1d64), region = 100  ;;  %p654_p4 = scmp.lt.s32.totalorder (!%p590_p3), %s3897_s2, 15 }
   0xc   : > { %p3899_p5 = scmp.ne.s32.totalorder (!%p590_p3), %s4668_s1, 0 }
  0x12   : > { %s5570_s2 = smov (!%p654_p4, %s3897_s2), 15  ;;  %673 = sbr.rel (%p3899_p5) target bundleno = 25 (0x19), region = 104 }
  0x13   : > { %s3898_s25 = sshll.u32 %s5570_s2, 3  ;;  %vm674_vm0 = vcmask (!%p3899_p5), 261120   ;;  %vm677_vm1 = vcmask (!%p3899_p5), 523264   ;;  %v4678_v0 = vmov (!%p3899_p5), 0.0   ;;  %v4679_v1 = vmov (!%p3899_p5), -inf  }
  0x14   : > { %s4823_s28 = scalar_lea.vmem %s5556_s27, %s3898_s25  ;;  %675 = vst.msk [vmem:[#allocation3] sm:$0xff] (!%p3899_p5), %vm674_vm0, %v4678_v0  ;;  %676 = vst.msk [vmem:[#allocation4] sm:$0xff] (!%p3899_p5), %vm674_vm0, %v4678_v0 }
  0x15   : > { %678 = vst.msk [vmem:[#allocation5] sm:$0xff] (!%p3899_p5), %vm677_vm1, %v4678_v0  ;;  %679 = vst.msk [vmem:[#allocation6] sm:$0xff] (!%p3899_p5), %vm677_vm1, %v4678_v0 }
  0x16   : > { %680 = vst.msk [vmem:[#allocation7] sm:$0xff] (!%p3899_p5), %vm677_vm1, %v4679_v1 }
  0x19 PF: > { %s5557_s30 = sld [smem:[#allocation9_spill]]  ;;  %s5558_s3 = sld [smem:[#allocation11_spill]]  ;;  %vm762_vm2 = vcmask 130048   ;;  %v4680_v5 = vmov 0.0|0.0   ;;  %v745_v8 = vld [vmem:[%s4823_s28] sm:$0xff]  ;;  %vm4681_vm3 = vmmov 0   ;;  %v711_v24 = vlaneseq }
  0x1a   : > { %4209 = vmatprep.subr.bf16.mxu1 %v4680_v5  ;;  %4054 = vmatprep.mubr.msk.f32.mxu0 %vm762_vm2, %v745_v8  ;;  %v4682_v12 = vmov 0.0   ;;  %v746_v13 = vld [vmem:[%s4823_s28 + $0x8] sm:$0xff]  ;;  %vm906_vm4 = vcmask 261120   ;;  %s5559_s26 = sld [smem:[#allocation10_spill]]  ;;  %v4683_v28 = vmov 1.0   ;;  %s5545_s27 = smov 64  }
  0x1b   : > { %4074 = vmatprep.mubr.msk.f32.mxu1 %vm4681_vm3, %v4682_v12  ;;  %v900_v15 = vld [vmem:[#allocation3] sm:$0xff]  ;;  %v4869_v27 = vand.u32 127, %v711_v24  ;;  %v901_v34 = vld [vmem:[#allocation4] sm:$0xff]  ;;  %s5547_s4 = smov 32   ;;  %v696_v42 = vld [vmem:[%s5525_s5 + $0x18] sm:$0xff]  ;;  %s5560_s21 = sld [smem:[#allocation12_spill]] }
  0x1c   : > { %v694_v41 = vld [vmem:[%s5525_s5 + $0x8] sm:$0xff]  ;;  %v693_v43 = vld [vmem:[%s5525_s5] sm:$0xff]  ;;  %v695_v45 = vld [vmem:[%s5525_s5 + $0x10] sm:$0xff]  ;;  %vm1010_vm8 = vcmask 523264   ;;  %p3958_p6 = scmp.ne.s32.totalorder %s4668_s1, 1 }
  0x1d   : > { %vm729_vm5 = vcmp.ge.s32.totalorder %v4869_v27, 64  ;;  %vm730_vm6 = vcmp.lt.s32.totalorder %v4869_v27, 96  ;;  %v4901_v44 = vpack.c.bf16 %v696_v42, %v694_v41  ;;  %v747_v46 = vld [vmem:[%s4823_s28 + $0x10] sm:$0xff]  ;;  %v748_v47 = vld [vmem:[%s4823_s28 + $0x18] sm:$0xff]  ;;  %v4908_v48 = vpack.c.bf16 %v695_v45, %v693_v43  ;;  %v698_v49 = vld [vmem:[%s5525_s5 + $0x28] sm:$0xff]  ;;  %s4693_s0 = smov (!%p3958_p6), 14  }
  0x1e   : > { %vm731_vm7 = vmand %vm729_vm5, %vm730_vm6  ;;  %v700_v50 = vld [vmem:[%s5525_s5 + $0x38] sm:$0xff]  ;;  %v697_v51 = vld [vmem:[%s5525_s5 + $0x20] sm:$0xff]  ;;  %vm3223_vm10 = vcmask (!%p3958_p6), 1046528   ;;  %vm4688_vm11 = vmmov (!%p3958_p6), 1   ;;  %vm4689_vm13 = vmmov (!%p3958_p6), 0   ;;  %vm3219_vm14 = vcmask (!%p3958_p6), 121856  }
  0x1f   : > { %v753_v2 = vld [vmem:[%s5557_s30] sm:$0xff]  ;;  %v754_v3 = vld [vmem:[%s5557_s30 + $0x8] sm:$0xff]  ;;  %v683_v10 = vld [vmem:[%s5558_s3 + $0x10] sm:$0xff]  ;;  %v4874_v29 = vsel %vm731_vm7, 2.0, %v4683_v28  ;;  %v4877_v31 = vsel %vm731_vm7, -1.0, %v4682_v12  ;;  %v4922_v52 = vpack.c.bf16 %v700_v50, %v698_v49  ;;  %vm3378_vm15 = vcmask (!%p3958_p6), 48128  }
  0x20   : > { %v681_v4 = vld [vmem:[%s5558_s3] sm:$0xff]  ;;  %v4205_v6 = vpack.c.bf16 %v754_v3, %v753_v2  ;;  %v682_v7 = vld [vmem:[%s5558_s3 + $0x8] sm:$0xff]  ;;  %v684_v11 = vld [vmem:[%s5558_s3 + $0x18] sm:$0xff]  ;;  %s4686_s3 = smov 96   ;;  %vm3810_vm5 = vcmask (!%p3958_p6), 113664   ;;  %vm3812_vm6 = vcmask (!%p3958_p6), 195584  }
  0x21   : > { %v4840_v9 = vpack.c.bf16 %v682_v7, %v681_v4  ;;  %v4853_v14 = vpack.c.bf16 %v684_v11, %v683_v10  ;;  %v4863_v16 = vld [vmem:[%s5559_s26] ss:$0 sm:$0xff]  ;;  %v699_v53 = vld [vmem:[%s5525_s5 + $0x30] sm:$0xff]  ;;  %v750_v56 = vld [vmem:[%s4823_s28 + $0x28] sm:$0xff] }
  0x22   : > { %4206 = vmatprep.subr.bf16.mxu0 %v4205_v6  ;;  %v749_v54 = vld [vmem:[%s4823_s28 + $0x20] sm:$0xff]  ;;  %v4929_v55 = vpack.c.bf16 %v699_v53, %v697_v51  ;;  %v702_v57 = vld [vmem:[%s5525_s5 + $0x48] sm:$0xff]  ;;  %v704_v58 = vld [vmem:[%s5525_s5 + $0x58] sm:$0xff] }
  0x23   : > { %4211 = vmatpush3.bf16.msra.mxu1 %v4840_v9  ;;  %4208 = vmatpush3.bf16.msra.mxu0 %v4205_v6  ;;  %v4940_v59 = vpack.c.bf16 %v704_v58, %v702_v57  ;;  %v701_v60 = vld [vmem:[%s5525_s5 + $0x40] sm:$0xff]  ;;  %v703_v61 = vld [vmem:[%s5525_s5 + $0x50] sm:$0xff]  ;;  %v706_v63 = vld [vmem:[%s5525_s5 + $0x68] sm:$0xff] }
  0x24   : > { %4212 = vmatprep.subr.bf16.mxu1 %v4680_v5  ;;  %4216 = vmatprep.subr.bf16.mxu0 %v4901_v44  ;;  %v751_v62 = vld [vmem:[%s4823_s28 + $0x30] sm:$0xff]  ;;  %v708_v0 = vld [vmem:[%s5525_s5 + $0x78] sm:$0xff]  ;;  %v4960_v1 = vpack.c.bf16 %v703_v61, %v701_v60  ;;  %v705_v4 = vld [vmem:[%s5525_s5 + $0x60] sm:$0xff] }
  0x25   : > { %v752_v2 = vld [vmem:[%s4823_s28 + $0x38] sm:$0xff]  ;;  %v4965_v3 = vpack.c.bf16 %v708_v0, %v706_v63  ;;  %v707_v6 = vld [vmem:[%s5525_s5 + $0x70] sm:$0xff]  ;;  %v686_v8 = vld [vmem:[%s5560_s21 + $0x8] sm:$0xff]  ;;  %s5561_s28 = smov 64  }
  0x26   : > { %4055 = vmatmul.mubr.msk.f32.vlgmr.msra.gmra.mrb[0].mxu0 %vm762_vm2, %v746_v13  ;;  %v688_v10 = vld [vmem:[%s5560_s21 + $0x18] sm:$0xff]  ;;  %v4983_v11 = vpack.c.bf16 %v707_v6, %v705_v4  ;;  %vm5417_vm12 = vmpackc.low (!%p3958_p6), %vm3223_vm10, %vm4688_vm11 }
  0x27   : > { %4214 = vmatpush3.bf16.msra.mxu1 %v4853_v14  ;;  %4057 = vmatprep.mubr.msk.f32.mxu0 %vm762_vm2, %v747_v46  ;;  %v4987_v13 = vpack.c.bf16 %v688_v10, %v686_v8 }
  0x28   : > { %4218 = vmatpush1.bf16.msra.mxu0 %v4908_v48  ;;  %4246 = vmatprep.subr.bf16.mxu1 %v4901_v44 }
  0x29   : > { %4220 = vmatprep.subr.bf16.mxu0 %v4922_v52 }
  0x2a   : > { %4075 = vmatmul.mubr.msk.f32.vlgmr.msra.gmra.mrb[0].mxu1 %vm906_vm4, %v900_v15  ;;  %4058 = vmatmul.mubr.msk.f32.gmra.mrb[2].mxu0 %vm762_vm2, %v748_v47  ;;  %v685_v15 = vld [vmem:[%s5560_s21] sm:$0xff] }
  0x2b   : > { %1368 = vmatprep.mubr.f32.mxu1 %v4682_v12  ;;  %4060 = vmatprep.mubr.msk.f32.mxu0 %vm762_vm2, %v749_v54 }
  0x2c   : > { %4248 = vmatpush1.bf16.msra.mxu1 %v4908_v48  ;;  %4222 = vmatpush1.bf16.msra.mxu0 %v4929_v55 }
  0x2d   : > { %4250 = vmatprep.subr.bf16.mxu1 %v4922_v52  ;;  %4224 = vmatprep.subr.bf16.mxu0 %v4940_v59 }
  0x2e   : > { %4061 = vmatmul.mubr.msk.f32.gmra.mrb[4].mxu0 %vm762_vm2, %v750_v56 }
  0x2f   : > { %4063 = vmatprep.mubr.msk.f32.mxu0 %vm762_vm2, %v751_v62 }
  0x30   : > { %4252 = vmatpush1.bf16.msra.mxu1 %v4929_v55  ;;  %4226 = vmatpush1.bf16.msra.mxu0 %v4960_v1 }
  0x31   : > { %4228 = vmatprep.subr.bf16.mxu0 %v4965_v3  ;;  %4254 = vmatprep.subr.bf16.mxu1 %v4940_v59 }
  0x32   : > { %4064 = vmatmul.mubr.msk.f32.gmra.mrb[6].mxu0 %vm762_vm2, %v752_v2  ;;  %vm3559_vm2 = vcmask (!%p3958_p6), 1045504  }
  0x33   : > { %1078 = vmatprep.mubr.f32.mxu0 %v4682_v12 }
  0x34   : > { %4256 = vmatpush1.bf16.msra.mxu1 %v4960_v1  ;;  %4230 = vmatpush1.bf16.msra.mxu0 %v4983_v11 }
  0x35   : > { %4258 = vmatprep.subr.bf16.mxu1 %v4965_v3  ;;  %4232 = vmatprep.subr.bf16.mxu0 %v4987_v13 }
  0x38   : > { %4260 = vmatpush1.bf16.msra.mxu1 %v4983_v11 }
  0x39   : > { %4262 = vmatprep.subr.bf16.mxu1 %v4987_v13 }
  0xf9   : > { %v4865_v17 = vpop.f32.mrb[0].mxu0 }
  0xfa   : > { %v853_v18 = vpop.f32.mrb[1].mxu0  ;;  %v859_v45 = vadd.f32 %v4865_v17, %v4863_v16 }
  0xfb   : > { %v854_v19 = vadd.f32 %v4863_v16, %v853_v18  ;;  %v687_v18 = vld [vmem:[%s5560_s21 + $0x10] sm:$0xff] }
  0xfd   : > { %v976_v20 = vpop.f32.mrb[0].mxu1 }
  0xfe   : > { %v980_v21 = vadd.f32 %v976_v20, %v854_v19  ;;  %v4076_v22 = vpop.f32.mrb[1].mxu1  ;;  %v690_v19 = vld [vmem:[%s5560_s21 + $0x28] sm:$0xff]  ;;  %v692_v20 = vld [vmem:[%s5560_s21 + $0x38] sm:$0xff] }
  0xff   : > { %v5005_v22 = vpack.c.bf16 %v687_v18, %v685_v15 }
 0x100   : > { %v3911_v23 = vmul.f32 -1.442695, %v980_v21  ;;  %v902_v21 = vld [vmem:[#allocation5] sm:$0xff] }
 0x101   : > { %3912 = vmatmul.mubr.msk.f32.vlgmr.msra.gmra.mrb[8].mxu0 %vm1010_vm8, %v902_v21 }
 0x102   : > { %4525 = vpow2.f32 %v3911_v23  ;;  %v5008_v23 = vpack.c.bf16 %v692_v20, %v690_v19  ;;  %4234 = vmatpush1.bf16.msra.mxu0 %v5005_v22  ;;  %1154 = vmatprep.mubr.f32.mxu0 %v4682_v12 }
 0x104   : > { %4236 = vmatprep.subr.bf16.mxu0 %v5008_v23 }
 0x10c   : > { %v4526_v25 = vpop.eup %4525 }
 0x10d   : > { %v984_v26 = vadd.f32 1.0, %v4526_v25  ;;  %v689_v25 = vld [vmem:[%s5560_s21 + $0x20] sm:$0xff] }
 0x10f   : > { %4527 = vrcp.f32 %v984_v26  ;;  %v691_v26 = vld [vmem:[%s5560_s21 + $0x30] sm:$0xff] }
 0x119   : > { %v4528_v30 = vpop.eup %4527 }
 0x11a   : > { %v987_v32 = vmul.f32 %v4528_v30, %v4874_v29  ;;  %v5020_v30 = vpack.c.bf16 %v691_v26, %v689_v25  ;;  %v903_v25 = vld [vmem:[#allocation6] sm:$0xff]  ;;  %v712_v26 = vshrl.u32 %v711_v24, 7 }
 0x11c   : > { %v4881_v33 = vadd.f32 %v987_v32, %v4877_v31  ;;  %4238 = vmatpush1.bf16.msra.mxu0 %v5020_v30 }
 0x11d   : > { %4239 = vmatprep.subr.bf16.mxu0 %v4680_v5 }
 0x11e   : > { %995 = vrot.lane.b32.xlu0 %v4881_v33, %s5545_s27 }
 0x122   : > { %990 = vrot.lane.b32.xlu0 %v901_v34, %s5547_s4 }
 0x190   : > { %v996_v35 = vpop.permute.xlu0 %995 }
 0x191   : > { %v998_v36 = vmul.f32 %v996_v35, %v4881_v33  ;;  %v5028_v35 = vpop.f32.mrb[2].mxu0 }
 0x193   : > { %1000 = vrot.lane.b32.xlu1 %v998_v36, %s5547_s4  ;;  %s5562_s4 = smov 32   ;;  %v863_v36 = vpop.f32.mrb[3].mxu0 }
 0x194   : > { %v991_v37 = vpop.permute.xlu0 %990 }
 0x195   : > { %v993_v38 = vmul.f32 %v991_v37, %v4881_v33  ;;  %v5030_v37 = vpop.f32.mrb[4].mxu0 }
 0x205   : > { %v1001_v39 = vpop.permute.xlu1 %1000 }
 0x206   : > { %v4889_v40 = vadd.f32 %v1001_v39, %v993_v38  ;;  %v5032_v38 = vpop.f32.mrb[5].mxu0 }
 0x207   : > { %v5034_v39 = vpop.f32.mrb[6].mxu0 }
 0x208   : > { %4529 = vtanh.f32 %v4889_v40  ;;  %v5036_v41 = vpop.f32.mrb[7].mxu0 }
 0x212   : > { %v4530_v7 = vpop.eup %4529 }
 0x213   : > { %1006 = vrot.lane.b32.xlu1 %v4530_v7, %s5561_s28 }
 0x285   : > { %v1007_v32 = vpop.permute.xlu1 %1006 }
 0x286   : > { %v1009_v34 = vmul.f32 %v1007_v32, %v4881_v33  ;;  %v717_v32 = vsub.s32 1, %v712_v26 }
 0x288   : > { %1086 = vrot.lane.b32.xlu0 %v1009_v34, %s5562_s4  ;;  %v709_v34 = vld [vmem:[%s5526_s6] sm:$0x3] }
 0x2fa   : > { %v1087_v42 = vpop.permute.xlu0 %1086 }
 0x2fb   : > { %3913 = vmatmul.mubr.msk.f32.vlgmr.msra.gmra.mrb[8].mxu0 %vm906_vm4, %v1087_v42 }
 0x2fc   : > { %4241 = vmatpush3.bf16.msra.mxu0 %v4840_v9  ;;  %4085 = vmatprep.mubr.msk.f32.mxu0 %vm4681_vm3, %v4682_v12 }
 0x2fd   : > { %4242 = vmatprep.subr.bf16.mxu0 %v4680_v5 }
 0x300   : > { %4244 = vmatpush3.bf16.msra.mxu0 %v4853_v14 }
 0x301   : > { %4269 = vmatprep.subr.bf16.mxu0 %v4680_v5 }
 0x303   : > { %4086 = vmatmul.mubr.msk.f32.vlgmr.msra.gmra.mrb[10].mxu0 %vm906_vm4, %v1087_v42 }
 0x304   : > { %4271 = vmatpush3.bf16.msra.mxu0 %v4840_v9  ;;  %4096 = vmatprep.mubr.msk.f32.mxu0 %vm4681_vm3, %v4682_v12 }
 0x305   : > { %4272 = vmatprep.subr.bf16.mxu0 %v4680_v5 }
 0x308   : > { %4274 = vmatpush3.bf16.msra.mxu0 %v4853_v14 }
 0x309   : > { %4276 = vmatprep.subr.bf16.mxu0 %v4901_v44 }
 0x3ce   : > { %v1156_v33 = vpop.f32.mrb[8].mxu0 }
 0x3cf   : > { %v1158_v43 = vpop.f32.mrb[9].mxu0 }
 0x3d6   : > { %v1269_v46 = vpop.f32.mrb[10].mxu0 }
 0x3d7   : > { %v1273_v47 = vadd.f32 %v1269_v46, %v859_v45  ;;  %v4087_v49 = vpop.f32.mrb[11].mxu0  ;;  %v713_v45 = vsub.s32 0, %v712_v26 }
 0x3d9   : > { %v3917_v50 = vmul.f32 -1.442695, %v1273_v47  ;;  %v5089_v47 = vrot.slane %v709_v34, %v713_v45 }
 0x3db   : > { %4531 = vpow2.f32 %v3917_v50  ;;  %v1161_v49 = vadd.f32 %v1156_v33, %v5089_v47 }
 0x3dd   : > { %v3914_v50 = vmul.f32 -1.442695, %v1161_v49 }
 0x3e5   : > { %v4532_v51 = vpop.eup %4531 }
 0x3e6   : > { %v1277_v53 = vadd.f32 1.0, %v4532_v51 }
 0x3e8   : > { %4533 = vrcp.f32 %v1277_v53 }
 0x3f2   : > { %v4534_v54 = vpop.eup %4533 }
 0x3f3   : > { %v1280_v56 = vmul.f32 %v4534_v54, %v4874_v29  ;;  %v734_v54 = vadd.s32 128, %v4869_v27 }
 0x3f5   : > { %v1281_v57 = vadd.f32 %v1280_v56, %v4877_v31  ;;  %vm738_vm9 = vcmp.lt.s32.totalorder %v734_v54, 192 }
 0x3f7   : > { %1284 = vrot.lane.b32.xlu1 %v1281_v57, %s5561_s28  ;;  %v1282_v17 = vmul.f32 %v1281_v57, %v4889_v40  ;;  %v864_v40 = vadd.f32 %v4863_v16, %v863_v36  ;;  %v5086_v36 = vrot.slane %v709_v34, %v717_v32 }
 0x3f9   : > { %v1162_v42 = vadd.f32 %v1158_v43, %v5086_v36  ;;  %v5094_v43 = vsel %vm738_vm9, 2.0, %v4683_v28 }
 0x3fb   : > { %v3915_v46 = vmul.f32 -1.442695, %v1162_v42  ;;  %v869_v42 = vadd.f32 %v5028_v35, %v4863_v16 }
 0x469   : > { %v1285_v58 = vpop.permute.xlu1 %1284 }
 0x46a   : > { %v1287_v60 = vmul.f32 %v1285_v58, %v1281_v57 }
 0x46c   : > { %1289 = vrot.lane.b32.xlu0 %v1287_v60, %s5562_s4  ;;  %v5098_v60 = vsel %vm738_vm9, -1.0, %v4682_v12 }
 0x4de   : > { %v1290_v61 = vpop.permute.xlu0 %1289 }
 0x4df   : > { %v5059_v62 = vadd.f32 %v1290_v61, %v1282_v17 }
 0x4e1   : > { %4535 = vtanh.f32 %v5059_v62 }
 0x4eb   : > { %v4536_v63 = vpop.eup %4535 }
 0x4ec   : > { %1295 = vrot.lane.b32.xlu1 %v4536_v63, %s5561_s28 }
 0x55e   : > { %v1296_v0 = vpop.permute.xlu1 %1295 }
 0x55f   : > { %v1298_v2 = vmul.f32 %v1296_v0, %v1281_v57 }
 0x561   : > { %1376 = vrot.lane.b32.xlu0 %v1298_v2, %s5562_s4 }
 0x5d3   : > { %v5064_v4 = vpop.permute.xlu0 %1376 }
 0x5d4   : > { %4097 = vmatmul.mubr.msk.f32.vlgmr.msra.gmra.mrb[12].mxu0 %vm906_vm4, %v5064_v4 }
 0x5d5   : > { %4278 = vmatpush1.bf16.msra.mxu0 %v4908_v48  ;;  %1651 = vmatprep.mubr.f32.mxu0 %v4682_v12 }
 0x5d6   : > { %4280 = vmatprep.subr.bf16.mxu0 %v4922_v52 }
 0x5d9   : > { %4282 = vmatpush1.bf16.msra.mxu0 %v4929_v55 }
 0x5da   : > { %4284 = vmatprep.subr.bf16.mxu0 %v4940_v59 }
 0x5dd   : > { %4286 = vmatpush1.bf16.msra.mxu0 %v4960_v1 }
 0x5de   : > { %4288 = vmatprep.subr.bf16.mxu0 %v4965_v3 }
 0x5e1   : > { %4290 = vmatpush1.bf16.msra.mxu0 %v4983_v11 }
 0x5e2   : > { %4292 = vmatprep.subr.bf16.mxu0 %v4987_v13 }
 0x6a7   : > { %v1552_v6 = vpop.f32.mrb[12].mxu0 }
 0x6a8   : > { %v1556_v7 = vadd.f32 %v1552_v6, %v864_v40  ;;  %v4098_v8 = vpop.f32.mrb[13].mxu0 }
 0x6aa   : > { %v3923_v10 = vmul.f32 -1.442695, %v1556_v7 }
 0x6ac   : > { %4537 = vpow2.f32 %v3923_v10 }
 0x6b6   : > { %v4538_v15 = vpop.eup %4537 }
 0x6b7   : > { %v1560_v18 = vadd.f32 1.0, %v4538_v15 }
 0x6b9   : > { %4539 = vrcp.f32 %v1560_v18 }
 0x6ba   : > { %4541 = vpow2.f32 %v3915_v46 }
 0x6bb   : > { %4543 = vpow2.f32 %v3914_v50 }
 0x6c3   : > { %v4540_v19 = vpop.eup %4539 }
 0x6c4   : > { %v1563_v20 = vmul.f32 %v4540_v19, %v4874_v29  ;;  %v4542_v51 = vpop.eup %4541 }
 0x6c5   : > { %v1170_v24 = vadd.f32 1.0, %v4542_v51  ;;  %v4544_v53 = vpop.eup %4543 }
 0x6c6   : > { %v1564_v21 = vadd.f32 %v1563_v20, %v4877_v31  ;;  %v1169_v56 = vadd.f32 1.0, %v4544_v53 }
 0x6c7   : > { %4545 = vrcp.f32 %v1170_v24 }
 0x6c8   : > { %1567 = vrot.lane.b32.xlu1 %v1564_v21, %s5561_s28  ;;  %4547 = vrcp.f32 %v1169_v56  ;;  %v1565_v2 = vmul.f32 %v1564_v21, %v5059_v62 }
 0x6cc   : > { %1180 = vrot.lane.b32.xlu1 %v903_v25, %s5561_s28 }
 0x6d1   : > { %v4546_v57 = vpop.eup %4545 }
 0x6d2   : > { %v1176_v58 = vmul.f32 %v4546_v57, %v5094_v43  ;;  %v4548_v63 = vpop.eup %4547 }
 0x6d4   : > { %v1178_v61 = vadd.f32 %v1176_v58, %v5098_v60 }
 0x6d6   : > { %v1184_v0 = vmul.f32 %v4548_v63, %v1178_v61 }
 0x73a   : > { %v1568_v33 = vpop.permute.xlu1 %1567 }
 0x73b   : > { %v1570_v17 = vmul.f32 %v1568_v33, %v1564_v21 }
 0x73d   : > { %1572 = vrot.lane.b32.xlu0 %v1570_v17, %s5562_s4 }
 0x73e   : > { %v1181_v40 = vpop.permute.xlu1 %1180 }
 0x73f   : > { %v1183_v7 = vmul.f32 %v4548_v63, %v1181_v40 }
 0x741   : > { %1186 = vrot.lane.b32.xlu0 %v1184_v0, %s5561_s28 }
 0x7af   : > { %v1573_v28 = vpop.permute.xlu0 %1572 }
 0x7b0   : > { %v5104_v6 = vadd.f32 %v1573_v28, %v1565_v2 }
 0x7b2   : > { %4549 = vtanh.f32 %v5104_v6 }
 0x7b3   : > { %v1187_v8 = vpop.permute.xlu0 %1186 }
 0x7b4   : > { %v5107_v10 = vadd.f32 %v1187_v8, %v1183_v7 }
 0x7b6   : > { %4551 = vtanh.f32 %v5107_v10 }
 0x7bc   : > { %v4550_v15 = vpop.eup %4549 }
 0x7bd   : > { %1578 = vrot.lane.b32.xlu1 %v4550_v15, %s5561_s28 }
 0x7c0   : > { %v4552_v18 = vpop.eup %4551 }
 0x7c1   : > { %v5111_v19 = vmul.f32 %v4552_v18, %v1178_v61 }
 0x7c3   : > { %1300 = vrot.lane.b32.xlu0 %v5111_v19, %s5561_s28 }
 0x82f   : > { %v1579_v62 = vpop.permute.xlu1 %1578 }
 0x830   : > { %v1581_v20 = vmul.f32 %v1579_v62, %v1564_v21 }
 0x832   : > { %1659 = vrot.lane.b32.xlu1 %v1581_v20, %s5562_s4 }
 0x835   : > { %v1301_v25 = vpop.permute.xlu0 %1300 }
 0x836   : > { %3918 = vmatmul.mubr.msk.f32.vlgmr.msra.gmra.mrb[2].mxu1 %vm1010_vm8, %v1301_v25 }
 0x837   : > { %4264 = vmatpush1.bf16.msra.mxu1 %v5005_v22  ;;  %1444 = vmatprep.mubr.f32.mxu1 %v4682_v12 }
 0x838   : > { %4266 = vmatprep.subr.bf16.mxu1 %v5008_v23 }
 0x83b   : > { %4268 = vmatpush1.bf16.msra.mxu1 %v5020_v30 }
 0x83c   : > { %4299 = vmatprep.subr.bf16.mxu1 %v4680_v5 }
 0x83e   : > { %3919 = vmatmul.mubr.msk.f32.vlgmr.msra.gmra.mrb[2].mxu1 %vm906_vm4, %v5064_v4 }
 0x83f   : > { %4301 = vmatpush3.bf16.msra.mxu1 %v4840_v9  ;;  %4107 = vmatprep.mubr.msk.f32.mxu1 %vm4681_vm3, %v4682_v12 }
 0x840   : > { %4302 = vmatprep.subr.bf16.mxu1 %v4680_v5 }
 0x843   : > { %4304 = vmatpush3.bf16.msra.mxu1 %v4853_v14 }
 0x844   : > { %4306 = vmatprep.subr.bf16.mxu1 %v4901_v44 }
 0x8a4   : > { %v5130_v21 = vpop.permute.xlu1 %1659 }
 0x8a5   : > { %4108 = vmatmul.mubr.msk.f32.vlgmr.msra.gmra.mrb[4].mxu1 %vm906_vm4, %v5130_v21 }
 0x8a6   : > { %4308 = vmatpush1.bf16.msra.mxu1 %v4908_v48  ;;  %1934 = vmatprep.mubr.f32.mxu1 %v4682_v12 }
 0x8a7   : > { %4310 = vmatprep.subr.bf16.mxu1 %v4922_v52 }
 0x8aa   : > { %4312 = vmatpush1.bf16.msra.mxu1 %v4929_v55 }
 0x8ab   : > { %4314 = vmatprep.subr.bf16.mxu1 %v4940_v59 }
 0x8ae   : > { %4316 = vmatpush1.bf16.msra.mxu1 %v4960_v1 }
 0x8af   : > { %4318 = vmatprep.subr.bf16.mxu1 %v4965_v3 }
 0x8b2   : > { %4320 = vmatpush1.bf16.msra.mxu1 %v4983_v11 }
 0x8b3   : > { %4322 = vmatprep.subr.bf16.mxu1 %v4987_v13 }
 0x911   : > { %v1446_v4 = vpop.f32.mrb[2].mxu1 }
 0x912   : > { %v1448_v26 = vpop.f32.mrb[3].mxu1  ;;  %v1451_v45 = vadd.f32 %v1446_v4, %v5089_v47 }
 0x913   : > { %v1452_v32 = vadd.f32 %v1448_v26, %v5086_v36 }
 0x914   : > { %v3920_v51 = vmul.f32 -1.442695, %v1451_v45 }
 0x915   : > { %v3921_v34 = vmul.f32 -1.442695, %v1452_v32 }
 0x917   : > { %4553 = vpow2.f32 %v3921_v34 }
 0x921   : > { %v4554_v53 = vpop.eup %4553 }
 0x922   : > { %v1460_v54 = vadd.f32 1.0, %v4554_v53 }
 0x978   : > { %v1835_v46 = vpop.f32.mrb[4].mxu1 }
 0x979   : > { %v1839_v49 = vadd.f32 %v1835_v46, %v869_v42  ;;  %v4109_v50 = vpop.f32.mrb[5].mxu1 }
 0x97b   : > { %v3929_v24 = vmul.f32 -1.442695, %v1839_v49 }
 0x97d   : > { %4555 = vpow2.f32 %v3929_v24 }
 0x97e   : > { %4557 = vpow2.f32 %v3920_v51 }
 0x97f   : > { %4559 = vrcp.f32 %v1460_v54 }
 0x987   : > { %v4556_v56 = vpop.eup %4555 }
 0x988   : > { %v1843_v57 = vadd.f32 1.0, %v4556_v56  ;;  %v4558_v58 = vpop.eup %4557 }
 0x989   : > { %v1459_v33 = vadd.f32 1.0, %v4558_v58  ;;  %v4560_v17 = vpop.eup %4559 }
 0x98a   : > { %4561 = vrcp.f32 %v1843_v57  ;;  %v1466_v35 = vmul.f32 %v4560_v17, %v5094_v43 }
 0x98b   : > { %4563 = vrcp.f32 %v1459_v33 }
 0x98c   : > { %v1468_v2 = vadd.f32 %v1466_v35, %v5098_v60 }
 0x994   : > { %v4562_v61 = vpop.eup %4561 }
 0x995   : > { %v1846_v63 = vmul.f32 %v4562_v61, %v4874_v29  ;;  %v4564_v40 = vpop.eup %4563 }
 0x996   : > { %v1470_v28 = vmul.f32 %v4564_v40, %v1468_v2  ;;  %v1469_v15 = vmul.f32 %v4564_v40, %v5107_v10 }
 0x997   : > { %v1847_v0 = vadd.f32 %v1846_v63, %v4877_v31 }
 0x999   : > { %1850 = vrot.lane.b32.xlu0 %v1847_v0, %s5561_s28  ;;  %v1848_v4 = vmul.f32 %v1847_v0, %v5104_v6 }
 0x99d   : > { %1472 = vrot.lane.b32.xlu0 %v1470_v28, %s5561_s28 }
 0xa0b   : > { %v1851_v7 = vpop.permute.xlu0 %1850 }
 0xa0c   : > { %v1853_v8 = vmul.f32 %v1851_v7, %v1847_v0  ;;  %v874_v7 = vadd.f32 %v4863_v16, %v5032_v38 }
 0xa0e   : > { %1855 = vrot.lane.b32.xlu1 %v1853_v8, %s5562_s4 }
 0xa0f   : > { %v1473_v18 = vpop.permute.xlu0 %1472 }
 0xa10   : > { %v1475_v62 = vadd.f32 %v1473_v18, %v1469_v15 }
 0xa12   : > { %4565 = vtanh.f32 %v1475_v62 }
 0xa1c   : > { %v4566_v20 = vpop.eup %4565 }
 0xa1d   : > { %v5155_v25 = vmul.f32 %v4566_v20, %v1468_v2 }
 0xa1f   : > { %1583 = vrot.lane.b32.xlu0 %v5155_v25, %s5561_s28 }
 0xa80   : > { %v1856_v26 = vpop.permute.xlu1 %1855 }
 0xa81   : > { %v5160_v32 = vadd.f32 %v1856_v26, %v1848_v4 }
 0xa83   : > { %4567 = vtanh.f32 %v5160_v32 }
 0xa8d   : > { %v4568_v34 = vpop.eup %4567 }
 0xa8e   : > { %1861 = vrot.lane.b32.xlu1 %v4568_v34, %s5561_s28 }
 0xa91   : > { %v1584_v10 = vpop.permute.xlu0 %1583 }
 0xa92   : > { %3924 = vmatmul.mubr.msk.f32.vlgmr.msra.gmra.mrb[14].mxu0 %vm1010_vm8, %v1584_v10 }
 0xa93   : > { %4294 = vmatpush1.bf16.msra.mxu0 %v5005_v22  ;;  %1727 = vmatprep.mubr.f32.mxu0 %v4682_v12 }
 0xa94   : > { %4296 = vmatprep.subr.bf16.mxu0 %v5008_v23 }
 0xa97   : > { %4298 = vmatpush1.bf16.msra.mxu0 %v5020_v30 }
 0xa98   : > { %4329 = vmatprep.subr.bf16.mxu0 %v4680_v5 }
 0xa9a   : > { %3925 = vmatmul.mubr.msk.f32.vlgmr.msra.gmra.mrb[14].mxu0 %vm906_vm4, %v5130_v21 }
 0xa9b   : > { %4331 = vmatpush3.bf16.msra.mxu0 %v4840_v9  ;;  %4118 = vmatprep.mubr.msk.f32.mxu0 %vm4681_vm3, %v4682_v12 }
 0xa9c   : > { %4332 = vmatprep.subr.bf16.mxu0 %v4680_v5 }
 0xa9f   : > { %4334 = vmatpush3.bf16.msra.mxu0 %v4853_v14 }
 0xaa0   : > { %4336 = vmatprep.subr.bf16.mxu0 %v4901_v44 }
 0xb00   : > { %v1862_v6 = vpop.permute.xlu1 %1861 }
 0xb01   : > { %v1864_v42 = vmul.f32 %v1862_v6, %v1847_v0 }
 0xb03   : > { %1942 = vrot.lane.b32.xlu1 %v1864_v42, %s5562_s4 }
 0xb6d   : > { %v1729_v45 = vpop.f32.mrb[14].mxu0 }
 0xb6e   : > { %v1734_v46 = vadd.f32 %v1729_v45, %v5089_v47  ;;  %v1731_v49 = vpop.f32.mrb[15].mxu0 }
 0xb6f   : > { %v1735_v21 = vadd.f32 %v1731_v49, %v5086_v36 }
 0xb70   : > { %v3926_v50 = vmul.f32 -1.442695, %v1734_v46 }
 0xb71   : > { %v3927_v51 = vmul.f32 -1.442695, %v1735_v21 }
 0xb72   : > { %4569 = vpow2.f32 %v3926_v50 }
 0xb73   : > { %4571 = vpow2.f32 %v3927_v51 }
 0xb75   : > { %v1943_v24 = vpop.permute.xlu1 %1942 }
 0xb76   : > { %4119 = vmatmul.mubr.msk.f32.vlgmr.msra.gmra.mrb[16].mxu0 %vm906_vm4, %v1943_v24 }
 0xb77   : > { %4338 = vmatpush1.bf16.msra.mxu0 %v4908_v48  ;;  %2217 = vmatprep.mubr.f32.mxu0 %v4682_v12 }
 0xb78   : > { %4340 = vmatprep.subr.bf16.mxu0 %v4922_v52 }
 0xb7b   : > { %4342 = vmatpush1.bf16.msra.mxu0 %v4929_v55 }
 0xb7c   : > { %v4570_v53 = vpop.eup %4569  ;;  %4344 = vmatprep.subr.bf16.mxu0 %v4940_v59 }
 0xb7d   : > { %v4572_v54 = vpop.eup %4571  ;;  %v1742_v57 = vadd.f32 1.0, %v4570_v53 }
 0xb7e   : > { %v1743_v56 = vadd.f32 1.0, %v4572_v54 }
 0xb7f   : > { %4346 = vmatpush1.bf16.msra.mxu0 %v4960_v1 }
 0xb80   : > { %4573 = vrcp.f32 %v1743_v56  ;;  %4348 = vmatprep.subr.bf16.mxu0 %v4965_v3 }
 0xb81   : > { %4575 = vrcp.f32 %v1742_v57 }
 0xb83   : > { %4350 = vmatpush1.bf16.msra.mxu0 %v4983_v11 }
 0xb84   : > { %4352 = vmatprep.subr.bf16.mxu0 %v4987_v13 }
 0xb8a   : > { %v4574_v58 = vpop.eup %4573 }
 0xb8b   : > { %v1749_v33 = vmul.f32 %v4574_v58, %v5094_v43  ;;  %v4576_v35 = vpop.eup %4575 }
 0xb8c   : > { %v1752_v63 = vmul.f32 %v4576_v35, %v1475_v62 }
 0xb8d   : > { %v1751_v17 = vadd.f32 %v1749_v33, %v5098_v60 }
 0xb8f   : > { %v1753_v61 = vmul.f32 %v4576_v35, %v1751_v17 }
 0xb91   : > { %1755 = vrot.lane.b32.xlu1 %v1753_v61, %s5561_s28 }
 0xc03   : > { %v1756_v0 = vpop.permute.xlu1 %1755 }
 0xc04   : > { %v5194_v2 = vadd.f32 %v1756_v0, %v1752_v63 }
 0xc06   : > { %4577 = vtanh.f32 %v5194_v2 }
 0xc10   : > { %v4578_v40 = vpop.eup %4577 }
 0xc11   : > { %v5197_v28 = vmul.f32 %v4578_v40, %v1751_v17 }
 0xc13   : > { %1866 = vrot.lane.b32.xlu1 %v5197_v28, %s5561_s28 }
 0xc49   : > { %v2118_v8 = vpop.f32.mrb[16].mxu0 }
 0xc4a   : > { %v2122_v15 = vadd.f32 %v2118_v8, %v874_v7  ;;  %v4120_v18 = vpop.f32.mrb[17].mxu0 }
 0xc4c   : > { %v3935_v20 = vmul.f32 -1.442695, %v2122_v15 }
 0xc4e   : > { %4579 = vpow2.f32 %v3935_v20 }
 0xc58   : > { %v4580_v62 = vpop.eup %4579 }
 0xc59   : > { %v2126_v4 = vadd.f32 1.0, %v4580_v62 }
 0xc5b   : > { %4581 = vrcp.f32 %v2126_v4 }
 0xc65   : > { %v4582_v26 = vpop.eup %4581 }
 0xc66   : > { %v2129_v34 = vmul.f32 %v4582_v26, %v4874_v29  ;;  %v879_v26 = vadd.f32 %v5030_v37, %v4863_v16 }
 0xc68   : > { %v2130_v10 = vadd.f32 %v2129_v34, %v4877_v31 }
 0xc6a   : > { %2133 = vrot.lane.b32.xlu0 %v2130_v10, %s5561_s28  ;;  %v2131_v45 = vmul.f32 %v2130_v10, %v5160_v32 }
 0xc85   : > { %v1867_v6 = vpop.permute.xlu1 %1866 }
 0xc86   : > { %3930 = vmatmul.mubr.msk.f32.vlgmr.msra.gmra.mrb[6].mxu1 %vm1010_vm8, %v1867_v6 }
 0xc87   : > { %4324 = vmatpush1.bf16.msra.mxu1 %v5005_v22  ;;  %2010 = vmatprep.mubr.f32.mxu1 %v4682_v12 }
 0xc88   : > { %4326 = vmatprep.subr.bf16.mxu1 %v5008_v23 }
 0xc8b   : > { %4328 = vmatpush1.bf16.msra.mxu1 %v5020_v30 }
 0xc8c   : > { %4359 = vmatprep.subr.bf16.mxu1 %v4680_v5 }
 0xc8e   : > { %3931 = vmatmul.mubr.msk.f32.vlgmr.msra.gmra.mrb[6].mxu1 %vm906_vm4, %v1943_v24 }
 0xc8f   : > { %4361 = vmatpush3.bf16.msra.mxu1 %v4840_v9  ;;  %4129 = vmatprep.mubr.msk.f32.mxu1 %vm4681_vm3, %v4682_v12 }
 0xc90   : > { %4362 = vmatprep.subr.bf16.mxu1 %v4680_v5 }
 0xc93   : > { %4364 = vmatpush3.bf16.msra.mxu1 %v4853_v14 }
 0xc94   : > { %4366 = vmatprep.subr.bf16.mxu1 %v4901_v44 }
 0xcdc   : > { %v2134_v38 = vpop.permute.xlu0 %2133 }
 0xcdd   : > { %v2136_v42 = vmul.f32 %v2134_v38, %v2130_v10 }
 0xcdf   : > { %2138 = vrot.lane.b32.xlu0 %v2136_v42, %s5562_s4 }
 0xd51   : > { %v2139_v46 = vpop.permute.xlu0 %2138 }
 0xd52   : > { %v5221_v49 = vadd.f32 %v2139_v46, %v2131_v45 }
 0xd54   : > { %4583 = vtanh.f32 %v5221_v49 }
 0xd5e   : > { %v4584_v21 = vpop.eup %4583 }
 0xd5f   : > { %2144 = vrot.lane.b32.xlu0 %v4584_v21, %s5561_s28 }
 0xd61   : > { %v2012_v50 = vpop.f32.mrb[6].mxu1 }
 0xd62   : > { %v2017_v51 = vadd.f32 %v2012_v50, %v5089_v47  ;;  %v2014_v24 = vpop.f32.mrb[7].mxu1 }
 0xd63   : > { %v2018_v53 = vadd.f32 %v2014_v24, %v5086_v36 }
 0xd64   : > { %v3932_v54 = vmul.f32 -1.442695, %v2017_v51 }
 0xd65   : > { %v3933_v56 = vmul.f32 -1.442695, %v2018_v53 }
 0xd66   : > { %4585 = vpow2.f32 %v3932_v54 }
 0xd67   : > { %4587 = vpow2.f32 %v3933_v56 }
 0xd70   : > { %v4586_v57 = vpop.eup %4585 }
 0xd71   : > { %v4588_v32 = vpop.eup %4587  ;;  %v2025_v33 = vadd.f32 1.0, %v4586_v57 }
 0xd72   : > { %v2026_v58 = vadd.f32 1.0, %v4588_v32 }
 0xd74   : > { %4589 = vrcp.f32 %v2026_v58 }
 0xd75   : > { %4591 = vrcp.f32 %v2025_v33 }
 0xd7e   : > { %v4590_v17 = vpop.eup %4589 }
 0xd7f   : > { %v2032_v35 = vmul.f32 %v4590_v17, %v5094_v43  ;;  %v4592_v63 = vpop.eup %4591 }
 0xd80   : > { %v2035_v8 = vmul.f32 %v4592_v63, %v5194_v2 }
 0xd81   : > { %v2034_v61 = vadd.f32 %v2032_v35, %v5098_v60 }
 0xd83   : > { %v2036_v0 = vmul.f32 %v4592_v63, %v2034_v61 }
 0xd85   : > { %2038 = vrot.lane.b32.xlu0 %v2036_v0, %s5561_s28 }
 0xdd1   : > { %v2145_v40 = vpop.permute.xlu0 %2144 }
 0xdd2   : > { %v2147_v7 = vmul.f32 %v2145_v40, %v2130_v10 }
 0xdd4   : > { %2225 = vrot.lane.b32.xlu1 %v2147_v7, %s5562_s4 }
 0xdf7   : > { %v2039_v15 = vpop.permute.xlu0 %2038 }
 0xdf8   : > { %v5232_v18 = vadd.f32 %v2039_v15, %v2035_v8 }
 0xdfa   : > { %4593 = vtanh.f32 %v5232_v18 }
 0xe04   : > { %v4594_v20 = vpop.eup %4593 }
 0xe05   : > { %v5235_v62 = vmul.f32 %v4594_v20, %v2034_v61 }
 0xe07   : > { %2149 = vrot.lane.b32.xlu0 %v5235_v62, %s5561_s28 }
 0xe46   : > { %v2226_v4 = vpop.permute.xlu1 %2225 }
 0xe47   : > { %4130 = vmatmul.mubr.msk.f32.vlgmr.msra.gmra.mrb[8].mxu1 %vm906_vm4, %v2226_v4 }
 0xe48   : > { %4368 = vmatpush1.bf16.msra.mxu1 %v4908_v48  ;;  %2500 = vmatprep.mubr.f32.mxu1 %v4682_v12 }
 0xe49   : > { %4370 = vmatprep.subr.bf16.mxu1 %v4922_v52 }
 0xe4c   : > { %4372 = vmatpush1.bf16.msra.mxu1 %v4929_v55 }
 0xe4d   : > { %4374 = vmatprep.subr.bf16.mxu1 %v4940_v59 }
 0xe50   : > { %4376 = vmatpush1.bf16.msra.mxu1 %v4960_v1 }
 0xe51   : > { %4378 = vmatprep.subr.bf16.mxu1 %v4965_v3 }
 0xe54   : > { %4380 = vmatpush1.bf16.msra.mxu1 %v4983_v11 }
 0xe55   : > { %4382 = vmatprep.subr.bf16.mxu1 %v4987_v13 }
 0xe79   : > { %v2150_v2 = vpop.permute.xlu0 %2149 }
 0xe7a   : > { %3936 = vmatmul.mubr.msk.f32.vlgmr.msra.gmra.mrb[18].mxu0 %vm1010_vm8, %v2150_v2 }
 0xe7b   : > { %4354 = vmatpush1.bf16.msra.mxu0 %v5005_v22  ;;  %2293 = vmatprep.mubr.f32.mxu0 %v4682_v12 }
 0xe7c   : > { %4356 = vmatprep.subr.bf16.mxu0 %v5008_v23 }
 0xe7f   : > { %4358 = vmatpush1.bf16.msra.mxu0 %v5020_v30 }
 0xe80   : > { %4389 = vmatprep.subr.bf16.mxu0 %v4680_v5 }
 0xe82   : > { %3937 = vmatmul.mubr.msk.f32.vlgmr.msra.gmra.mrb[18].mxu0 %vm906_vm4, %v2226_v4 }
 0xe83   : > { %4391 = vmatpush3.bf16.msra.mxu0 %v4840_v9  ;;  %4140 = vmatprep.mubr.msk.f32.mxu0 %vm4681_vm3, %v4682_v12 }
 0xe84   : > { %4392 = vmatprep.subr.bf16.mxu0 %v4680_v5 }
 0xe87   : > { %4394 = vmatpush3.bf16.msra.mxu0 %v4853_v14 }
 0xe88   : > { %4396 = vmatprep.subr.bf16.mxu0 %v4901_v44 }
 0xf1a   : > { %v2401_v34 = vpop.f32.mrb[8].mxu1 }
 0xf1b   : > { %v2405_v10 = vadd.f32 %v2401_v34, %v879_v26  ;;  %v4131_v6 = vpop.f32.mrb[9].mxu1 }
 0xf1d   : > { %v3941_v38 = vmul.f32 -1.442695, %v2405_v10 }
 0xf1f   : > { %4595 = vpow2.f32 %v3941_v38 }
 0xf29   : > { %v4596_v42 = vpop.eup %4595 }
 0xf2a   : > { %v2409_v45 = vadd.f32 1.0, %v4596_v42  ;;  %v5313_v42 = vld [vmem:[%s5559_s26] ss:$0 sm:$0xff] }
 0xf2c   : > { %4597 = vrcp.f32 %v2409_v45  ;;  %v884_v45 = vadd.f32 %v5313_v42, %v5036_v41 }
 0xf36   : > { %v4598_v46 = vpop.eup %4597 }
 0xf37   : > { %v2412_v21 = vmul.f32 %v4598_v46, %v4874_v29 }
 0xf39   : > { %v2413_v50 = vadd.f32 %v2412_v21, %v4877_v31 }
 0xf3b   : > { %2416 = vrot.lane.b32.xlu1 %v2413_v50, %s5561_s28  ;;  %v2414_v17 = vmul.f32 %v2413_v50, %v5221_v49 }
 0xf55   : > { %v2295_v51 = vpop.f32.mrb[18].mxu0 }
 0xf56   : > { %v2297_v24 = vpop.f32.mrb[19].mxu0  ;;  %v2300_v56 = vadd.f32 %v2295_v51, %v5089_v47 }
 0xf57   : > { %v2301_v16 = vadd.f32 %v2297_v24, %v5086_v36 }
 0xf58   : > { %v3938_v57 = vmul.f32 -1.442695, %v2300_v56 }
 0xf59   : > { %v3939_v37 = vmul.f32 -1.442695, %v2301_v16 }
 0xf5b   : > { %4599 = vpow2.f32 %v3939_v37 }
 0xf5c   : > { %4601 = vpow2.f32 %v3938_v57 }
 0xf65   : > { %v4600_v32 = vpop.eup %4599 }
 0xf66   : > { %v2309_v58 = vadd.f32 1.0, %v4600_v32  ;;  %v4602_v33 = vpop.eup %4601 }
 0xf67   : > { %v2308_v61 = vadd.f32 1.0, %v4602_v33 }
 0xf68   : > { %4603 = vrcp.f32 %v2309_v58 }
 0xf72   : > { %v4604_v0 = vpop.eup %4603 }
 0xf73   : > { %v2315_v40 = vmul.f32 %v4604_v0, %v5094_v43 }
 0xf75   : > { %v2317_v7 = vadd.f32 %v2315_v40, %v5098_v60 }
 0xfad   : > { %v2417_v53 = vpop.permute.xlu1 %2416 }
 0xfae   : > { %v2419_v54 = vmul.f32 %v2417_v53, %v2413_v50 }
 0xfb0   : > { %2421 = vrot.lane.b32.xlu1 %v2419_v54, %s5562_s4 }
0x1022   : > { %v2422_v35 = vpop.permute.xlu1 %2421 }
0x1023   : > { %v5271_v63 = vadd.f32 %v2422_v35, %v2414_v17 }
0x1025   : > { %4605 = vtanh.f32 %v5271_v63 }
0x1026   : > { %4607 = vrcp.f32 %v2308_v61 }
0x102f   : > { %v4606_v8 = vpop.eup %4605 }
0x1030   : > { %2427 = vrot.lane.b32.xlu0 %v4606_v8, %s5561_s28  ;;  %v4608_v15 = vpop.eup %4607 }
0x1031   : > { %v2319_v20 = vmul.f32 %v4608_v15, %v2317_v7  ;;  %v2318_v2 = vmul.f32 %v4608_v15, %v5232_v18 }
0x1034   : > { %2321 = vrot.lane.b32.xlu0 %v2319_v20, %s5561_s28 }
0x10a2   : > { %v2428_v49 = vpop.permute.xlu0 %2427 }
0x10a3   : > { %v2430_v4 = vmul.f32 %v2428_v49, %v2413_v50 }
0x10a5   : > { %2508 = vrot.lane.b32.xlu1 %v2430_v4, %s5562_s4 }
0x10a6   : > { %v2322_v26 = vpop.permute.xlu0 %2321 }
0x10a7   : > { %v5280_v34 = vadd.f32 %v2322_v26, %v2318_v2 }
0x10a9   : > { %4609 = vtanh.f32 %v5280_v34 }
0x10b3   : > { %v4610_v10 = vpop.eup %4609 }
0x10b4   : > { %v5283_v6 = vmul.f32 %v4610_v10, %v2317_v7 }
0x10b6   : > { %2432 = vrot.lane.b32.xlu1 %v5283_v6, %s5561_s28 }
0x1117   : > { %v2509_v38 = vpop.permute.xlu1 %2508 }
0x1118   : > { %4141 = vmatmul.mubr.msk.f32.vlgmr.msra.gmra.mrb[20].mxu0 %vm906_vm4, %v2509_v38 }
0x1119   : > { %4398 = vmatpush1.bf16.msra.mxu0 %v4908_v48  ;;  %2783 = vmatprep.mubr.f32.mxu0 %v4682_v12 }
0x111a   : > { %4400 = vmatprep.subr.bf16.mxu0 %v4922_v52 }
0x111d   : > { %4402 = vmatpush1.bf16.msra.mxu0 %v4929_v55 }
0x111e   : > { %4404 = vmatprep.subr.bf16.mxu0 %v4940_v59 }
0x1121   : > { %4406 = vmatpush1.bf16.msra.mxu0 %v4960_v1 }
0x1122   : > { %4408 = vmatprep.subr.bf16.mxu0 %v4965_v3 }
0x1125   : > { %4410 = vmatpush1.bf16.msra.mxu0 %v4983_v11 }
0x1126   : > { %4412 = vmatprep.subr.bf16.mxu0 %v4987_v13 }
0x1128   : > { %v2433_v18 = vpop.permute.xlu1 %2432 }
0x1129   : > { %3942 = vmatmul.mubr.msk.f32.vlgmr.msra.gmra.mrb[10].mxu1 %vm1010_vm8, %v2433_v18 }
0x112a   : > { %4384 = vmatpush1.bf16.msra.mxu1 %v5005_v22  ;;  %2576 = vmatprep.mubr.f32.mxu1 %v4682_v12 }
0x112b   : > { %4386 = vmatprep.subr.bf16.mxu1 %v5008_v23 }
0x112e   : > { %4388 = vmatpush1.bf16.msra.mxu1 %v5020_v30 }
0x112f   : > { %4419 = vmatprep.subr.bf16.mxu1 %v4680_v5 }
0x1131   : > { %3943 = vmatmul.mubr.msk.f32.vlgmr.msra.gmra.mrb[10].mxu1 %vm906_vm4, %v2509_v38 }
0x1132   : > { %4421 = vmatpush3.bf16.msra.mxu1 %v4840_v9  ;;  %4151 = vmatprep.mubr.msk.f32.mxu1 %vm4681_vm3, %v4682_v12 }
0x1133   : > { %4422 = vmatprep.subr.bf16.mxu1 %v4680_v5 }
0x1136   : > { %4424 = vmatpush3.bf16.msra.mxu1 %v4853_v14 }
0x1137   : > { %4426 = vmatprep.subr.bf16.mxu1 %v4901_v44 }
0x11eb   : > { %v2684_v46 = vpop.f32.mrb[20].mxu0 }
0x11ec   : > { %v2688_v21 = vadd.f32 %v2684_v46, %v884_v45  ;;  %v4142_v9 = vpop.f32.mrb[21].mxu0 }
0x11ee   : > { %v3947_v50 = vmul.f32 -1.442695, %v2688_v21 }
0x11f0   : > { %4611 = vpow2.f32 %v3947_v50 }
0x11fa   : > { %v4612_v51 = vpop.eup %4611 }
0x11fb   : > { %v2692_v24 = vadd.f32 1.0, %v4612_v51 }
0x11fd   : > { %4613 = vrcp.f32 %v2692_v24 }
0x1204   : > { %v2578_v5 = vpop.f32.mrb[10].mxu1 }
0x1205   : > { %v2580_v14 = vpop.f32.mrb[11].mxu1  ;;  %v2583_v57 = vadd.f32 %v2578_v5, %v5089_v47 }
0x1206   : > { %v2584_v41 = vadd.f32 %v2580_v14, %v5086_v36 }
0x1207   : > { %v4614_v53 = vpop.eup %4613  ;;  %v3944_v32 = vmul.f32 -1.442695, %v2583_v57 }
0x1208   : > { %v2695_v44 = vmul.f32 %v4614_v53, %v4874_v29  ;;  %v3945_v56 = vmul.f32 -1.442695, %v2584_v41 }
0x120a   : > { %v2696_v54 = vadd.f32 %v2695_v44, %v4877_v31  ;;  %4615 = vpow2.f32 %v3945_v56 }
0x120b   : > { %4617 = vpow2.f32 %v3944_v32 }
0x120c   : > { %2699 = vrot.lane.b32.xlu0 %v2696_v54, %s5561_s28  ;;  %v2697_v35 = vmul.f32 %v2696_v54, %v5271_v63 }
0x1214   : > { %v4616_v58 = vpop.eup %4615 }
0x1215   : > { %v2592_v33 = vadd.f32 1.0, %v4616_v58  ;;  %v4618_v17 = vpop.eup %4617 }
0x1216   : > { %v2591_v0 = vadd.f32 1.0, %v4618_v17 }
0x1217   : > { %4619 = vrcp.f32 %v2592_v33 }
0x1221   : > { %v4620_v7 = vpop.eup %4619 }
0x1222   : > { %v2598_v8 = vmul.f32 %v4620_v7, %v5094_v43 }
0x1224   : > { %v2600_v15 = vadd.f32 %v2598_v8, %v5098_v60 }
0x127e   : > { %v2700_v16 = vpop.permute.xlu0 %2699 }
0x127f   : > { %v2702_v37 = vmul.f32 %v2700_v16, %v2696_v54 }
0x1281   : > { %2704 = vrot.lane.b32.xlu1 %v2702_v37, %s5562_s4 }
0x12f3   : > { %v2705_v61 = vpop.permute.xlu1 %2704 }
0x12f4   : > { %v5324_v40 = vadd.f32 %v2705_v61, %v2697_v35 }
0x12f6   : > { %4621 = vtanh.f32 %v5324_v40 }
0x12f7   : > { %4623 = vrcp.f32 %v2591_v0 }
0x1300   : > { %v4622_v20 = vpop.eup %4621 }
0x1301   : > { %2710 = vrot.lane.b32.xlu0 %v4622_v20, %s5561_s28  ;;  %v4624_v49 = vpop.eup %4623 }
0x1302   : > { %v2602_v4 = vmul.f32 %v4624_v49, %v2600_v15  ;;  %v2601_v26 = vmul.f32 %v4624_v49, %v5280_v34 }
0x1305   : > { %2604 = vrot.lane.b32.xlu0 %v2602_v4, %s5561_s28 }
0x1373   : > { %v2711_v63 = vpop.permute.xlu0 %2710 }
0x1374   : > { %v2713_v2 = vmul.f32 %v2711_v63, %v2696_v54 }
0x1376   : > { %2791 = vrot.lane.b32.xlu1 %v2713_v2, %s5562_s4 }
0x1377   : > { %v2605_v10 = vpop.permute.xlu0 %2604 }
0x1378   : > { %v2607_v38 = vadd.f32 %v2605_v10, %v2601_v26 }
0x137a   : > { %4625 = vtanh.f32 %v2607_v38 }
0x1384   : > { %v4626_v18 = vpop.eup %4625 }
0x1385   : > { %v5333_v45 = vmul.f32 %v4626_v18, %v2600_v15 }
0x1387   : > { %2715 = vrot.lane.b32.xlu1 %v5333_v45, %s5561_s28 }
0x13e8   : > { %v2792_v46 = vpop.permute.xlu1 %2791 }
0x13e9   : > { %4152 = vmatmul.mubr.msk.f32.vlgmr.msra.gmra.mrb[12].mxu1 %vm906_vm4, %v2792_v46 }
0x13ea   : > { %4428 = vmatpush1.bf16.msra.mxu1 %v4908_v48  ;;  %3066 = vmatprep.mubr.f32.mxu1 %v4682_v12  ;;  %v889_v48 = vadd.f32 %v5313_v42, %v5034_v39 }
0x13eb   : > { %4430 = vmatprep.subr.bf16.mxu1 %v4922_v52 }
0x13ee   : > { %4432 = vmatpush1.bf16.msra.mxu1 %v4929_v55 }
0x13ef   : > { %4434 = vmatprep.subr.bf16.mxu1 %v4940_v59 }
0x13f2   : > { %4436 = vmatpush1.bf16.msra.mxu1 %v4960_v1 }
0x13f3   : > { %4438 = vmatprep.subr.bf16.mxu1 %v4965_v3 }
0x13f6   : > { %4440 = vmatpush1.bf16.msra.mxu1 %v4983_v11 }
0x13f7   : > { %4442 = vmatprep.subr.bf16.mxu1 %v4987_v13 }
0x13f9   : > { %v2716_v34 = vpop.permute.xlu1 %2715 }
0x13fa   : > { %3948 = vmatmul.mubr.msk.f32.vlgmr.msra.gmra.mrb[22].mxu0 %vm1010_vm8, %v2716_v34 }
0x13fb   : > { %4414 = vmatpush1.bf16.msra.mxu0 %v5005_v22  ;;  %2859 = vmatprep.mubr.f32.mxu0 %v4682_v12 }
0x13fc   : > { %4416 = vmatprep.subr.bf16.mxu0 %v5008_v23 }
0x13ff   : > { %4418 = vmatpush1.bf16.msra.mxu0 %v5020_v30 }
0x1402   : > { %3949 = vmatmul.mubr.msk.f32.vlgmr.msra.gmra.mrb[22].mxu0 %vm906_vm4, %v2792_v46 }
0x14bc   : > { %v2967_v52 = vpop.f32.mrb[12].mxu1 }
0x14bd   : > { %v2971_v55 = vadd.f32 %v2967_v52, %v889_v48  ;;  %v4153_v59 = vpop.f32.mrb[13].mxu1 }
0x14bf   : > { %v3953_v1 = vmul.f32 -1.442695, %v2971_v55 }
0x14c1   : > { %4627 = vpow2.f32 %v3953_v1 }
0x14cb   : > { %v4628_v3 = vpop.eup %4627 }
0x14cc   : > { %v2975_v11 = vadd.f32 1.0, %v4628_v3 }
0x14ce   : > { %4629 = vrcp.f32 %v2975_v11 }
0x14d5   : > { %v2861_v13 = vpop.f32.mrb[22].mxu0 }
0x14d6   : > { %v2866_v21 = vadd.f32 %v2861_v13, %v5089_v47  ;;  %v2863_v9 = vpop.f32.mrb[23].mxu0 }
0x14d7   : > { %v2867_v50 = vadd.f32 %v2863_v9, %v5086_v36 }
0x14d8   : > { %v4630_v51 = vpop.eup %4629  ;;  %v3950_v24 = vmul.f32 -1.442695, %v2866_v21 }
0x14d9   : > { %v3951_v5 = vmul.f32 -1.442695, %v2867_v50  ;;  %v2978_v14 = vmul.f32 %v4630_v51, %v4874_v29 }
0x14da   : > { %4631 = vpow2.f32 %v3950_v24 }
0x14db   : > { %4633 = vpow2.f32 %v3951_v5  ;;  %v2979_v39 = vadd.f32 %v2978_v14, %v4877_v31 }
0x14dd   : > { %2982 = vrot.lane.b32.xlu0 %v2979_v39, %s5561_s28  ;;  %v2980_v61 = vmul.f32 %v2979_v39, %v5324_v40  ;;  %v3900_v40 = vld [vmem:[%s5527_s7] ss:$0 sm:$0xff] }
0x14e4   : > { %v4632_v42 = vpop.eup %4631 }
0x14e5   : > { %v4634_v53 = vpop.eup %4633  ;;  %v2874_v54 = vadd.f32 1.0, %v4632_v42 }
0x14e6   : > { %v2875_v44 = vadd.f32 1.0, %v4634_v53 }
0x14e8   : > { %4635 = vrcp.f32 %v2875_v44 }
0x14e9   : > { %4637 = vrcp.f32 %v2874_v54 }
0x14f2   : > { %v4636_v16 = vpop.eup %4635 }
0x14f3   : > { %v2881_v37 = vmul.f32 %v4636_v16, %v5094_v43  ;;  %v4638_v56 = vpop.eup %4637 }
0x14f4   : > { %v2884_v31 = vmul.f32 %v4638_v56, %v2607_v38 }
0x14f5   : > { %v2883_v41 = vadd.f32 %v2881_v37, %v5098_v60 }
0x14f7   : > { %v2885_v57 = vmul.f32 %v4638_v56, %v2883_v41 }
0x14f9   : > { %2887 = vrot.lane.b32.xlu0 %v2885_v57, %s5561_s28 }
0x154f   : > { %v2983_v29 = vpop.permute.xlu0 %2982 }
0x1550   : > { %v2985_v32 = vmul.f32 %v2983_v29, %v2979_v39 }
0x1552   : > { %2987 = vrot.lane.b32.xlu1 %v2985_v32, %s5562_s4 }
0x156b   : > { %v2888_v58 = vpop.permute.xlu0 %2887 }
0x156c   : > { %v2890_v33 = vadd.f32 %v2888_v58, %v2884_v31  ;;  %v3213_v31 = vld [vmem:[%s5530_s10] sm:$0xff] (!%p3958_p6)  ;;  %v3214_v58 = vld [vmem:[%s5530_s10 + $0x8] sm:$0xff] (!%p3958_p6) }
0x156e   : > { %4639 = vtanh.f32 %v2890_v33 }
0x1578   : > { %v4640_v17 = vpop.eup %4639 }
0x1579   : > { %v2892_v35 = vmul.f32 %v4640_v17, %v2883_v41  ;;  %v4687_v17 = vmov (!%p3958_p6), 0.0|0.0  }
0x157a   : > { %4449 = vmatprep.subr.bf16.mxu0 (!%p3958_p6), %v4687_v17 }
0x157b   : > { %2998 = vrot.lane.b32.xlu0 %v2892_v35, %s5561_s28 }
0x15c4   : > { %v2988_v0 = vpop.permute.xlu1 %2987 }
0x15c5   : > { %v2990_v7 = vadd.f32 %v2988_v0, %v2980_v61  ;;  %v3218_v61 = vld [vmem:[%s5531_s11 + $0x8] sm:$0x7f] (!%p3958_p6) }
0x15c7   : > { %4641 = vtanh.f32 %v2990_v7 }
0x15d1   : > { %v4642_v8 = vpop.eup %4641 }
0x15d2   : > { %2993 = vrot.lane.b32.xlu1 %v4642_v8, %s5561_s28 }
0x15ed   : > { %v2999_v15 = vpop.permute.xlu0 %2998 }
0x15ee   : > { %3954 = vmatmul.mubr.msk.f32.vlgmr.msra.gmra.mrb[14].mxu1 %vm1010_vm8, %v2999_v15  ;;  %v3216_v15 = vld [vmem:[%s5530_s10 + $0x18] sm:$0xff] (!%p3958_p6) }
0x15ef   : > { %4444 = vmatpush1.bf16.msra.mxu1 %v5005_v22  ;;  %3142 = vmatprep.mubr.f32.mxu1 %v4682_v12 }
0x15f0   : > { %4446 = vmatprep.subr.bf16.mxu1 %v5008_v23 }
0x15f3   : > { %4448 = vmatpush1.bf16.msra.mxu1 %v5020_v30 }
0x15f4   : > { %4453 = vmatprep.subr.bf16.mxu1 (!%p3958_p6), %v4687_v17 }
0x1644   : > { %v2994_v20 = vpop.permute.xlu1 %2993 }
0x1645   : > { %v2996_v49 = vmul.f32 %v2994_v20, %v2979_v39  ;;  %v4690_v20 = vmov (!%p3958_p6), 0.0  }
0x1646   : > { %4158 = vmatprep.mubr.msk.f32.mxu0 (!%p3958_p6), %vm4689_vm13, %v4690_v20 }
0x1647   : > { %3074 = vrot.lane.b32.xlu1 %v2996_v49, %s5562_s4  ;;  %s4691_s4 = smov (!%p3958_p6), 96  }
0x164b   : > { %1192 = vrot.lane.b32.xlu1 %v3900_v40, %s5561_s28  ;;  %v3959_v40 = vld [vmem:[%s5528_s8] ss:$0 sm:$0xff] (!%p3958_p6) }
0x16b9   : > { %v3075_v4 = vpop.permute.xlu1 %3074 }
0x16ba   : > { %3183 = vst.msk [vmem:[#allocation3] sm:$0xff] %vm906_vm4, %v3075_v4  ;;  %3955 = vmatmul.mubr.msk.f32.vlgmr.msra.gmra.mrb[14].mxu1 %vm906_vm4, %v3075_v4  ;;  %v3212_v4 = vld [vmem:[%s5529_s9] sm:$0xff] (!%p3958_p6) }
0x16bb   : > { %4169 = vmatprep.mubr.msk.f32.mxu1 (!%p3958_p6), %vm4689_vm13, %v4690_v20 }
0x16bd   : > { %v1193_v12 = vpop.permute.xlu1 %1192 }
0x16be   : > { %v1478_v22 = vmul.f32 %v5155_v25, %v1193_v12  ;;  %v2044_v23 = vmul.f32 %v5235_v62, %v1193_v12  ;;  %v2610_v30 = vmul.f32 %v5333_v45, %v1193_v12  ;;  %v1761_v59 = vmul.f32 %v5197_v28, %v1193_v12 }
0x16bf   : > { %v2327_v1 = vmul.f32 %v5283_v6, %v1193_v12  ;;  %v2893_v3 = vmul.f32 %v2892_v35, %v1193_v12  ;;  %v4454_v35 = vpack.c.bf16 (!%p3958_p6), %v3214_v58, %v3213_v31  ;;  %v3974_v31 = vld [vmem:[%s5539_s19] ss:$0 sm:$0xff] (!%p3958_p6) }
0x16c0   : > { %1480 = vrot.lane.b32.xlu1 %v1478_v22, %s5561_s28 }
0x16c1   : > { %4455 = vmatpush3.bf16.msra.mxu1 (!%p3958_p6), %v4454_v35 }
0x16c2   : > { %4456 = vmatprep.subr.bf16.mxu1 (!%p3958_p6), %v4687_v17 }
0x16c4   : > { %2046 = vrot.lane.b32.xlu1 %v2044_v23, %s5561_s28 }
0x16c8   : > { %2612 = vrot.lane.b32.xlu1 %v2610_v30, %s5561_s28 }
0x1732   : > { %v1481_v13 = vpop.permute.xlu1 %1480 }
0x1736   : > { %v2047_v50 = vpop.permute.xlu1 %2046 }
0x173a   : > { %v2613_v42 = vpop.permute.xlu1 %2612 }
0x178d   : > { %v3144_v63 = vpop.f32.mrb[14].mxu1 }
0x178e   : > { %v3149_v2 = vadd.f32 %v3144_v63, %v5089_v47  ;;  %v3146_v26 = vpop.f32.mrb[15].mxu1  ;;  %v3963_v63 = vld [vmem:[%s5532_s12] ss:$0 sm:$0xff] (!%p3958_p6) }
0x178f   : > { %v3150_v10 = vadd.f32 %v3146_v26, %v5086_v36  ;;  %v1195_v36 = vmul.f32 %v1193_v12, %v5111_v19  ;;  %v904_v19 = vld [vmem:[#allocation7] sm:$0xff] }
0x1790   : > { %v3956_v38 = vmul.f32 -1.442695, %v3149_v2 }
0x1791   : > { %v3957_v18 = vmul.f32 -1.442695, %v3150_v10 }
0x1792   : > { %4643 = vpow2.f32 %v3956_v38 }
0x1793   : > { %4645 = vpow2.f32 %v3957_v18 }
0x179c   : > { %v4644_v25 = vpop.eup %4643 }
0x179d   : > { %v4646_v46 = vpop.eup %4645  ;;  %v3157_v62 = vadd.f32 1.0, %v4644_v25 }
0x179e   : > { %v3158_v34 = vadd.f32 1.0, %v4646_v46 }
0x17a0   : > { %4647 = vrcp.f32 %v3158_v34 }
0x17a1   : > { %4649 = vrcp.f32 %v3157_v62 }
0x17aa   : > { %v4648_v48 = vpop.eup %4647 }
0x17ab   : > { %v3164_v45 = vmul.f32 %v4648_v48, %v5094_v43  ;;  %v4650_v55 = vpop.eup %4649  ;;  %v3406_v48 = vld [vmem:[%s5534_s14] sm:$0xff] (!%p3958_p6) }
0x17ac   : > { %v3167_v43 = vmul.f32 %v4650_v55, %v2890_v33  ;;  %v3217_v33 = vld [vmem:[%s5531_s11] sm:$0xff] (!%p3958_p6) }
0x17ad   : > { %v3166_v52 = vadd.f32 %v3164_v45, %v5098_v60  ;;  %v4450_v8 = vpack.c.bf16 (!%p3958_p6), %v3218_v61, %v3217_v33  ;;  %v3407_v45 = vld [vmem:[%s5534_s14 + $0x8] sm:$0x7f] (!%p3958_p6) }
0x17af   : > { %v3168_v47 = vmul.f32 %v4650_v55, %v3166_v52  ;;  %4452 = vmatpush3.bf16.msk.msra.mxu0 (!%p3958_p6), %vm5417_vm12, %v4450_v8  ;;  %v4460_v55 = vpack.c.bf16 (!%p3958_p6), %v3407_v45, %v3406_v48 }
0x17b0   : > { %4459 = vmatprep.subr.bf16.mxu0 (!%p3958_p6), %v4687_v17 }
0x17b1   : > { %3170 = vrot.lane.b32.xlu0 %v3168_v47, %s5561_s28  ;;  %v3403_v47 = vld [vmem:[%s5533_s13 + $0x8] sm:$0xff] (!%p3958_p6) }
0x17b2   : > { %4159 = vmatmul.mubr.msk.f32.vlgmr.msra.gmra.mrb[0].mxu0 (!%p3958_p6), %vm3219_vm14, %v3212_v4 }
0x17b3   : > { %4176 = vmatprep.mubr.msk.f32.mxu0 (!%p3958_p6), %vm4689_vm13, %v4690_v20  ;;  %4462 = vmatpush3.bf16.msk.msra.mxu0 (!%p3958_p6), %vm5417_vm12, %v4460_v55 }
0x17b4   : > { %4463 = vmatprep.subr.bf16.mxu0 (!%p3958_p6), %v4687_v17 }
0x17b5   : > { %1197 = vrot.lane.b32.xlu0 %v1195_v36, %s5561_s28 }
0x17b6   : > { %4177 = vmatmul.mubr.msk.f32.vlgmr.msra.gmra.mrb[2].mxu0 (!%p3958_p6), %vm3219_vm14, %v3212_v4 }
0x17b7   : > { %4187 = vmatprep.mubr.msk.f32.mxu0 (!%p3958_p6), %vm4689_vm13, %v4690_v20 }
0x17b9   : > { %1763 = vrot.lane.b32.xlu0 %v1761_v59, %s5561_s28 }
0x17bd   : > { %2329 = vrot.lane.b32.xlu0 %v2327_v1, %s5561_s28 }
0x17c1   : > { %2895 = vrot.lane.b32.xlu0 %v2893_v3, %s5561_s28 }
0x17c5   : > { %3185 = vrot.lane.b32.xlu0 %v2990_v7, %s4686_s3  ;;  %v3215_v7 = vld [vmem:[%s5530_s10 + $0x10] sm:$0xff] (!%p3958_p6)  ;;  %s4692_s3 = smov (!%p3958_p6), 6  }
0x17c6   : > { %v4457_v49 = vpack.c.bf16 (!%p3958_p6), %v3216_v15, %v3215_v7 }
0x17c8   : > { %4458 = vmatpush3.bf16.msra.mxu1 (!%p3958_p6), %v4457_v49 }
0x17c9   : > { %4190 = vmatprep.subr.mxu1 (!%p3958_p6), %v4690_v20 }
0x1823   : > { %v3171_v60 = vpop.permute.xlu0 %3170 }
0x1824   : > { %v3173_v11 = vadd.f32 %v3171_v60, %v3167_v43  ;;  %v3404_v60 = vld [vmem:[%s5533_s13 + $0x10] sm:$0xff] (!%p3958_p6) }
0x1826   : > { %4651 = vtanh.f32 %v3173_v11  ;;  %3195 = vrot.lane.b32.xlu0 %v3173_v11, %s5561_s28  ;;  %v3405_v11 = vld [vmem:[%s5533_s13 + $0x18] sm:$0xff] (!%p3958_p6) }
0x1827   : > { %v1198_v28 = vpop.permute.xlu0 %1197 }
0x1828   : > { %v1200_v21 = vmax.f32 %v904_v19, %v1198_v28  ;;  %v3555_v19 = vld [vmem:[%s5535_s15] sm:$0x3f] (!%p3958_p6) }
0x182a   : > { %v1483_v9 = vmax.f32 %v1200_v21, %v1481_v13  ;;  %v4467_v13 = vpack.c.bf16 (!%p3958_p6), %v3405_v11, %v3404_v60 }
0x182b   : > { %v1764_v6 = vpop.permute.xlu0 %1763 }
0x182c   : > { %v1766_v51 = vmax.f32 %v1483_v9, %v1764_v6 }
0x182e   : > { %v2049_v24 = vmax.f32 %v1766_v51, %v2047_v50 }
0x182f   : > { %v2330_v5 = vpop.permute.xlu0 %2329 }
0x1830   : > { %v4652_v14 = vpop.eup %4651  ;;  %v2332_v39 = vmax.f32 %v2049_v24, %v2330_v5  ;;  %v3642_v5 = vld [vmem:[%s5537_s17] sm:$0x3f] (!%p3958_p6) }
0x1831   : > { %v3175_v53 = vmul.f32 %v4652_v14, %v3166_v52  ;;  %v3402_v52 = vld [vmem:[%s5533_s13] sm:$0xff] (!%p3958_p6) }
0x1832   : > { %v2615_v44 = vmax.f32 %v2332_v39, %v2613_v42  ;;  %v4464_v36 = vpack.c.bf16 (!%p3958_p6), %v3403_v47, %v3402_v52 }
0x1833   : > { %v2896_v54 = vpop.permute.xlu0 %2895  ;;  %v3176_v16 = vmul.f32 %v3175_v53, %v1193_v12 }
0x1834   : > { %v2898_v37 = vmax.f32 %v2615_v44, %v2896_v54  ;;  %4465 = vmatpush3.bf16.msra.mxu0 (!%p3958_p6), %v4464_v36 }
0x1835   : > { %3178 = vrot.lane.b32.xlu1 %v3176_v16, %s5561_s28  ;;  %4466 = vmatprep.subr.bf16.mxu0 (!%p3958_p6), %v4687_v17  ;;  %v3970_v16 = vld [vmem:[%s5536_s16] ss:$0 sm:$0xff] (!%p3958_p6) }
0x1837   : > { %v3186_v41 = vpop.permute.xlu0 %3185 }
0x1838   : > { %3188 = vst.msk [vmem:[#allocation4] sm:$0xff] %vm906_vm4, %v3186_v41  ;;  %4468 = vmatpush3.bf16.msra.mxu0 (!%p3958_p6), %v4467_v13 }
0x1839   : > { %3190 = vrot.lane.b32.xlu1 %v3175_v53, %s5561_s28  ;;  %4200 = vmatprep.subr.mxu0 (!%p3958_p6), %v4690_v20 }
0x1885   : > { %v3293_v22 = vpop.f32.mrb[0].mxu0 (!%p3958_p6) }
0x1886   : > { %v4160_v23 = vpop.f32.mrb[1].mxu0 (!%p3958_p6) }
0x1889   : > { %v3477_v28 = vpop.f32.mrb[2].mxu0 (!%p3958_p6) }
0x188a   : > { %v4178_v21 = vpop.f32.mrb[3].mxu0 (!%p3958_p6) }
0x1898   : > { %v3196_v56 = vpop.permute.xlu0 %3195 }
0x1899   : > { %3198 = vst.msk [vmem:[#allocation6] sm:$0xff] %vm1010_vm8, %v3196_v56 }
0x18a6   : > { %3203 = sbr.rel (%p3958_p6) target bundleno = 7524 (0x1d64), region = 108 }
0x18a7   : > { %v3179_v57 = vpop.permute.xlu1 %3178 }
0x18a8   : > { %v3181_v29 = vmax.f32 %v2898_v37, %v3179_v57 }
0x18aa   : > { %3199 = vst.msk [vmem:[#allocation7] sm:$0xff] %vm1010_vm8, %v3181_v29  ;;  %v3211_v12 = vadd.f32 (!%p3958_p6), %v3959_v40, %v3181_v29 }
0x18ab   : > { %v3191_v32 = vpop.permute.xlu1 %3190 }
0x18ac   : > { %3193 = vst.msk [vmem:[#allocation5] sm:$0xff] %vm1010_vm8, %v3191_v32  ;;  %4170 = vmatmul.mubr.msk.f32.vlgmr.msra.gmra.mrb[0].mxu1 (!%p3958_p6), %vm906_vm4, %v3211_v12 }
0x18ad   : > { %4192 = vmatprep.mubr.msk.f32.mxu1 %vm4689_vm13, %v4690_v20  ;;  %4191 = vmatpush3.msk.msra.mxu1 %vm3559_vm2, %v3555_v19 }
0x18ae   : > { %4195 = vmatprep.subr.mxu1 %v4690_v20 }
0x197f   : > { %v3366_v30 = vpop.f32.mrb[0].mxu1 }
0x1980   : > { %v3367_v2 = vadd.f32 %v3366_v30, %v3293_v22  ;;  %v4171_v26 = vpop.f32.mrb[1].mxu1 }
0x1982   : > { %v5449_v10 = vadd.f32 %v3963_v63, %v3367_v2 }
0x1984   : > { %v3379_v38 = vsel %vm3378_vm15, %v5449_v10, -inf }
0x1985   : > { %3380 = vmax.xlane.f32.xlu0 %v3379_v38 }
0x1a12   : > { %v3381_v18 = vpop.xlane.xlu0 %3380 }
0x1a13   : > { %vm3382_vm0 = vcmp.eq.f32.partialorder %v5449_v10, %v3381_v18 }
0x1a14   : > { %v3383_v25 = vsel %vm3382_vm0, %v4869_v27, 6 }
0x1a15   : > { %v3384_v46 = vsel %vm3378_vm15, %v3383_v25, 2147483647 }
0x1a16   : > { %v3386_v34 = vshra.s32 %v3384_v46, 16  ;;  %v3385_v59 = vand.u32 65535, %v3384_v46 }
0x1a18   : > { %v3388_v62 = vcvt.s32.f32 %v3386_v34  ;;  %v3387_v3 = vcvt.s32.f32 %v3385_v59 }
0x1a1a   : > { %3389 = vmin.xlane.f32.xlu0 %v3388_v62 }
0x1aa7   : > { %v3390_v1 = vpop.xlane.xlu0 %3389 }
0x1aa8   : > { %vm3391_vm1 = vcmp.eq.f32.partialorder %v3388_v62, %v3390_v1  ;;  %v3396_v9 = vcvt.f32.s32 %v3390_v1 }
0x1aa9   : > { %v3392_v43 = vsel %vm3391_vm1, %v3387_v3, inf }
0x1aaa   : > { %3393 = vmin.xlane.f32.xlu1 %v3392_v43  ;;  %v3397_v6 = vshll.u32 %v3396_v9, 16 }
0x1abb   : > { %3481 = vrot.lane.b32.xlu1 %v3211_v12, %s4691_s4 }
0x1b37   : > { %v3394_v50 = vpop.xlane.xlu1 %3393 }
0x1b38   : > { %v3395_v51 = vcvt.f32.s32 %v3394_v50 }
0x1b3a   : > { %v3398_v24 = vadd.s32 %v3397_v6, %v3395_v51 }
0x1b3b   : > { %v3482_v14 = vpop.permute.xlu1 %3481 }
0x1b3c   : > { %vm3399_vm3 = vcmp.eq.s32.totalorder %v4869_v27, %v3398_v24  ;;  %4188 = vmatmul.mubr.msk.f32.vlgmr.msra.gmra.mrb[4].mxu0 %vm906_vm4, %v3482_v14  ;;  %v3643_v27 = vld [vmem:[%s5538_s18] sm:$0xff]  ;;  %vm3644_vm4 = vcmask 64512  }
0x1b3d   : > { %v3964_v39 = vsel %vm3399_vm3, 1.0, %v4690_v20  ;;  %4201 = vmatpush3.msk.msra.mxu0 %vm3559_vm2, %v3642_v5  ;;  %4202 = vmatprep.mubr.msk.f32.mxu0 %vm4689_vm13, %v4690_v20 }
0x1b3e   : > { %4193 = vmatmul.mubr.msk.f32.vlgmr.msra.gmra.mrb[2].mxu1 %vm3378_vm15, %v3964_v39 }
0x1b3f   : > { %4197 = vmatprep.mubr.msk.f32.mxu1 %vm4689_vm13, %v4690_v20  ;;  %4196 = vmatpush3.msra.mxu1 %v3643_v27 }
0x1b40   : > { %4203 = vmatmul.mubr.msk.f32.vlgmr.msra.gmra.mrb[6].mxu0 %vm3378_vm15, %v5449_v10 }
0x1c0f   : > { %v3551_v42 = vpop.f32.mrb[4].mxu0 }
0x1c10   : > { %v3552_v53 = vadd.f32 %v3551_v42, %v3477_v28  ;;  %v4189_v44 = vpop.f32.mrb[5].mxu0 }
0x1c11   : > { %v3629_v54 = vpop.f32.mrb[2].mxu1 }
0x1c12   : > { %v3633_v37 = vadd.f32 %v3629_v54, %v3552_v53  ;;  %v4194_v41 = vpop.f32.mrb[3].mxu1 }
0x1c13   : > { %v3790_v56 = vpop.f32.mrb[6].mxu0 }
0x1c14   : > { %v3641_v57 = vadd.f32 %v3970_v16, %v3633_v37  ;;  %v4204_v29 = vpop.f32.mrb[7].mxu0 }
0x1c16   : > { %3802 = vrot.lane.b32.xlu0 %v3641_v57, %s4692_s3  ;;  %4198 = vmatmul.mubr.msk.f32.vlgmr.msra.gmra.mrb[4].mxu1 %vm3644_vm4, %v3641_v57 }
0x1c88   : > { %v3803_v35 = vpop.permute.xlu0 %3802 }
0x1c89   : > { %v3809_v61 = vsel %vm3378_vm15, %v5449_v10, %v3803_v35 }
0x1ce9   : > { %v3714_v32 = vpop.f32.mrb[4].mxu1 }
0x1cea   : > { %v3791_v58 = vadd.f32 %v3790_v56, %v3714_v32  ;;  %v4199_v33 = vpop.f32.mrb[5].mxu1 }
0x1cec   : > { %v3801_v17 = vadd.f32 %v3974_v31, %v3791_v58 }
0x1cee   : > { %3806 = vrot.lane.b32.xlu1 %v3801_v17, %s4693_s0 }
0x1d60   : > { %v3807_v0 = vpop.permute.xlu1 %3806 }
0x1d61   : > { %v3811_v7 = vsel %vm3810_vm5, %v3809_v61, %v3807_v0 }
0x1d62   : > { %v3813_v8 = vsel %vm3812_vm6, %v3811_v7, 0.0 }
0x1d63   : > { %3814 = vst [vmem:[%s5540_s20] sm:$0xff] %v3813_v8 }
0x1d64 PF: > { %s30_s23 = sadd.s32 1, %s4676_s23   ;;  %s5565_s1 = smov %s4672_s22 }
0x1d65   : > { %p27_p7 = scmp.ge.s32.totalorder %s30_s23, 4   ;;  %s5566_s22 = smov %s5568_s24 }
0x1d67   :  { %29 = sbr.rel (!%p27_p7) target bundleno = 6 (0x6), region = 148 }

</bundles_post_ra>
